<compile_context>
chip_gen: v7x
topology: tpu7x:2x2x1
jax: 0.10.0
libtpu: 0.0.40
codegen_flags: <defaults>
</compile_context>

<pallas_src>
import functools

import jax
import jax.numpy as jnp
from jax import lax
from jax.experimental import pallas as pl
from jax.experimental.pallas import tpu as pltpu

_MAX_ROW_TILE = 2048   # packed (128-lane) rows per grid step -> 1 MiB/stream/block
_N_CHUNKS = 2          # outer "parallel" grid axis; collapsed to 1 for small inputs


def _cdiv(a, b):
    return -(-a // b)


def _round_up(x, m):
    return _cdiv(x, m) * m


def _packed_ce_kernel(logit_ref, onehot_ref, seg_ref, sum_ref, cnt_ref, *,
                      n_packed, inner_blocks, row_tile):
    """Masked softmax-CE partial sums over lane-packed rows.

    Each 128-lane row of the inputs holds R = 128 // C original rows back to
    back.  Per-original-row LSE is a segmented (C-lane) reduction done on the
    MXU via the block-diagonal 0/1 matrix in seg_ref.  The two (8, 128) outputs
    are resident accumulators across the inner (reduction) grid axis:
    CE partial sums, and valid-row indicators replicated C times per row.
    """
    ci = pl.program_id(0)   # parallel chunk axis
    ii = pl.program_id(1)   # reduction axis within the chunk

    @pl.when(ii == 0)
    def _init():
        sum_ref[...] = jnp.zeros_like(sum_ref)
        cnt_ref[...] = jnp.zeros_like(cnt_ref)

    # Un-clamped packed-row ids: mask both the ragged tail of the last real
    # block and fully redundant (clamped index_map) blocks.
    block_linear = ci * inner_blocks + ii
    row_ids = block_linear * row_tile + lax.broadcasted_iota(
        jnp.int32, (row_tile, 1), 0)
    valid = row_ids < n_packed                                        # (T, 1)

    # Load in native dtype, cast + sanitize in-kernel so undefined OOB rows
    # never feed exp/log.
    x = jnp.where(valid, logit_ref[...].astype(jnp.float32), 0.0)    # (T, 128)
    y = jnp.where(valid, onehot_ref[...].astype(jnp.float32), 0.0)   # (T, 128)
    s_mat = seg_ref[...]                                             # (128, 128)

    # Stabilizer: max over the whole 128-lane packed row (>= each segment max).
    row_max = jnp.max(x, axis=-1, keepdims=True)                     # XLU
    e = jnp.exp(x - row_max)                                         # EUP, dense

    # Segmented sums (replicated within each C-lane segment) on the MXU.
    # HIGHEST precision keeps the f32 exp values from being bf16-truncated.
    seg_sum = jnp.dot(e, s_mat, preferred_element_type=jnp.float32,
                      precision=jax.lax.Precision.HIGHEST)
    seg_sum = jnp.maximum(seg_sum, jnp.finfo(jnp.float32).tiny)      # no log(0)
    lse = jnp.log(seg_sum) + row_max                                 # per-row LSE, replicated

    # Exact -sum(onehot * log_softmax); masked rows (onehot == 0) contribute 0.
    ce = y * (lse - x)                                               # (T, 128)

    # Per-row "has a target" mask (sum of onehot over the segment > 0).  0/1
    # operands keep this matmul exact at any MXU precision.
    y_seg = jnp.dot(y, s_mat, preferred_element_type=jnp.float32,
                    precision=jax.lax.Precision.HIGHEST)
    has_tgt = (y_seg > 0.0).astype(jnp.float32)                      # replicated C times

    # Fold (T,128) -> (8,128) with pure VPU adds (leading-axis reshape is free)
    # and accumulate into the lane-dense resident output blocks.
    sum_ref[...] += jnp.sum(ce.reshape(row_tile // 8, 8, 128), axis=0)
    cnt_ref[...] += jnp.sum(has_tgt.reshape(row_tile // 8, 8, 128), axis=0)


def _packed_ce_partial_sums(packed_logits, packed_onehot, n_cls):
    """Run the Pallas kernel on (n_packed, 128) streams; return (ce_sum, count)."""
    n_packed = packed_logits.shape[0]
    row_tile = min(_MAX_ROW_TILE, _round_up(n_packed, 16))   # 16: bf16-safe sublanes
    n_blocks = _cdiv(n_packed, row_tile)
    n_chunks = _N_CHUNKS if n_blocks >= _N_CHUNKS else 1
    inner = _cdiv(n_blocks, n_chunks)

    # Block-diagonal 0/1 segment-sum matrix (one C-lane segment per original row).
    lane = jnp.arange(128, dtype=jnp.int32)
    seg_mat = (lane[:, None] // n_cls == lane[None, :] // n_cls).astype(jnp.float32)

    kernel = functools.partial(_packed_ce_kernel, n_packed=n_packed,
                               inner_blocks=inner, row_tile=row_tile)

    def in_map(ci, ii):
        # Clamp so redundant trailing blocks re-read a valid block; their rows
        # are masked in-kernel via the un-clamped packed-row ids.
        return (jnp.minimum(ci * inner + ii, n_blocks - 1), 0)

    sum_out, cnt_out = pl.pallas_call(
        kernel,
        out_shape=(
            jax.ShapeDtypeStruct((n_chunks * 8, 128), jnp.float32),
            jax.ShapeDtypeStruct((n_chunks * 8, 128), jnp.float32),
        ),
        grid_spec=pltpu.PrefetchScalarGridSpec(
            num_scalar_prefetch=0,
            grid=(n_chunks, inner),
            in_specs=[
                pl.BlockSpec((row_tile, 128), in_map),
                pl.BlockSpec((row_tile, 128), in_map),
                pl.BlockSpec((128, 128), lambda ci, ii: (0, 0)),  # stays resident
            ],
            out_specs=(
                pl.BlockSpec((8, 128), lambda ci, ii: (ci, 0)),
                pl.BlockSpec((8, 128), lambda ci, ii: (ci, 0)),
            ),
        ),
        # TODO(synk): on v7x try pltpu.CORE_PARALLEL on the chunk axis (or
        # pl.core_map over a 2-core mesh) to guarantee both TCs split this
        # bandwidth-bound reduction.
        compiler_params=pltpu.CompilerParams(
            dimension_semantics=("parallel", "arbitrary"),
            vmem_limit_bytes=32 * 1024 * 1024,
        ),
    )(packed_logits, packed_onehot, seg_mat)

    total = jnp.sum(sum_out)
    count = jnp.sum(cnt_out) / n_cls     # exact: indicator replicated C times
    return total, count


def _jnp_ce_sums(logits, onehot):
    """Tiny pure-JAX path (ragged tails / unsupported class counts)."""
    l = logits.astype(jnp.float32)
    o = onehot.astype(jnp.float32)
    logp = jax.nn.log_softmax(l, axis=-1)
    ce_sum = -jnp.sum(o * logp)
    count = jnp.sum((jnp.sum(o, axis=-1) > 0).astype(jnp.float32))
    return ce_sum, count


def masked_cross_entropy(pred_logits, true_onehot):
    """Mean softmax cross-entropy over rows whose one-hot/soft target is nonzero.

    pred_logits, true_onehot: (..., C).  Returns a scalar f32 mean CE
    (0 if no valid rows).
    """
    n_cls = pred_logits.shape[-1]
    logits = pred_logits.reshape(-1, n_cls)
    onehot = true_onehot.reshape(-1, n_cls)
    n_rows = logits.shape[0]

    if n_cls > 128 or 128 % n_cls != 0:
        # TODO(synk): lane-packed kernel requires the class count to divide 128
        # (true for molecular atom/bond vocabularies); plain XLA fallback here.
        s, c = _jnp_ce_sums(logits, onehot)
        return s / jnp.maximum(c, 1.0)

    rows_per_lane_row = 128 // n_cls
    n_packed = n_rows // rows_per_lane_row
    n_main = n_packed * rows_per_lane_row

    total = jnp.float32(0.0)
    count = jnp.float32(0.0)

    if n_main < n_rows:
        # < rows_per_lane_row leftover rows: negligible, avoids a jnp.pad copy
        # of the full tensors.
        ts, tc = _jnp_ce_sums(logits[n_main:], onehot[n_main:])
        total = total + ts
        count = count + tc

    if n_packed > 0:
        # Row-major contiguous (N, C) -> (N//R, 128) is a free reshape (no copy).
        packed_logits = logits[:n_main].reshape(n_packed, 128)
        packed_onehot = onehot[:n_main].reshape(n_packed, 128)
        ks, kc = _packed_ce_partial_sums(packed_logits, packed_onehot, n_cls)
        total = total + ks
        count = count + kc

    return total / jnp.maximum(count, 1.0)


@jax.jit
def train_ce_metrics(pred_X, true_X, pred_E, true_E):
    """Atom + bond CE dispatched back-to-back under one jit."""
    return (masked_cross_entropy(pred_X, true_X),
            masked_cross_entropy(pred_E, true_E))


class PlaceHolder:
    """Minimal stand-in for the MiDi PlaceHolder container (.X atoms, .E bonds)."""

    def __init__(self, X, E):
        self.X = X
        self.E = E


class TrainMolecularMetrics:
    def __init__(self, dataset_infos=None):
        # The torch __init__ registers nothing; nothing to do here.
        pass

    def forward(self, masked_pred, masked_true, log: bool):
        # Exact semantics of the PyTorch module: early `return None`.
        return None
        # TODO(synk): everything below the early return in the torch module is
        # unreachable dead code (torchmetrics updates + wandb logging); the CE
        # reduction it would perform is provided by `masked_cross_entropy`.

    def __call__(self, masked_pred, masked_true, log: bool):
        return self.forward(masked_pred, masked_true, log)

    def reset(self):
        return

    def log_epoch_metrics(self, current_epoch, local_rank):
        return


def _ref_masked_ce(pred, true):
    c = pred.shape[-1]
    logits = pred.reshape(-1, c).astype(jnp.float32)
    onehot = true.reshape(-1, c).astype(jnp.float32)
    mask = (jnp.sum(onehot, axis=-1) > 0).astype(jnp.float32)
    logp = jax.nn.log_softmax(logits, axis=-1)
    ce = -jnp.sum(onehot * logp, axis=-1)
    return jnp.sum(ce * mask) / jnp.maximum(jnp.sum(mask), 1.0)


if __name__ == "__main__":
    key = jax.random.PRNGKey(0)
    k1, k2, k3, k4, k5 = jax.random.split(key, 5)

    # Small molecular-graph shapes; n=9 exercises the packed-tail + masked paths.
    bs, n, dx, de = 2, 9, 16, 8

    # Predicted logits for atom types and bond types.
    pred_X = jax.random.normal(k1, (bs, n, dx), dtype=jnp.float32)
    pred_E = jax.random.normal(k2, (bs, n, n, de), dtype=jnp.float32)

    # One-hot ground truth, with some entries masked out (all-zero rows).
    x_idx = jax.random.randint(k3, (bs, n), 0, dx)
    e_idx = jax.random.randint(k4, (bs, n, n), 0, de)
    node_mask = (jax.random.uniform(k5, (bs, n)) > 0.25).astype(jnp.float32)
    edge_mask = node_mask[:, :, None] * node_mask[:, None, :]

    true_X = jax.nn.one_hot(x_idx, dx) * node_mask[..., None]
    true_E = jax.nn.one_hot(e_idx, de) * edge_mask[..., None]

    masked_pred = PlaceHolder(pred_X, pred_E)
    masked_true = PlaceHolder(true_X, true_E)

    # Faithful forward pass: returns None.
    metrics_module = TrainMolecularMetrics(dataset_infos=None)
    out = metrics_module(masked_pred, masked_true, log=True)
    assert out is None

    # Pallas hot-path kernel: the masked cross-entropy reduction the (dead)
    # metric-update path would have computed on atoms and bonds.
    atom_ce, bond_ce = train_ce_metrics(masked_pred.X, masked_true.X,
                                        masked_pred.E, masked_true.E)
    jax.block_until_ready((atom_ce, bond_ce))

    # Correctness check against a pure-JAX reference.
    atom_ref = _ref_masked_ce(masked_pred.X, masked_true.X)
    bond_ref = _ref_masked_ce(masked_pred.E, masked_true.E)
    assert jnp.allclose(atom_ce, atom_ref, rtol=1e-4, atol=1e-4)
    assert jnp.allclose(bond_ce, bond_ref, rtol=1e-4, atol=1e-4)

    print("KERNEL_OK")
</pallas_src>

<mosaic_0001>
module attributes {stable_mosaic.version = 11 : i64} {
  func.func @_packed_ce_kernel(%arg0: i32, %arg1: i32, %arg2: memref<16x128xf32, #tpu.memory_space<vmem>>, %arg3: memref<16x128xf32, #tpu.memory_space<vmem>>, %arg4: memref<128x128xf32, #tpu.memory_space<vmem>>, %arg5: memref<8x128xf32, #tpu.memory_space<vmem>>, %arg6: memref<8x128xf32, #tpu.memory_space<vmem>>) attributes {dimension_semantics = [#tpu.dimension_semantics<parallel>, #tpu.dimension_semantics<arbitrary>], iteration_bounds = array<i64: 1, 1>, scalar_prefetch = 0 : i64, scratch_operands = 0 : i64, tpu.core_type = #tpu.core_type<tc>, window_params = [{transform_indices = @transform_0, window_bounds = array<i64: 16, 128>}, {transform_indices = @transform_1, window_bounds = array<i64: 16, 128>}, {pipeline_mode = #tpu.pipeline_mode<synchronous>, transform_indices = @transform_2, window_bounds = array<i64: 128, 128>}, {transform_indices = @transform_3, window_bounds = array<i64: 8, 128>}, {transform_indices = @transform_4, window_bounds = array<i64: 8, 128>}]} {
    %c0_i32 = arith.constant 0 : i32
    %0 = arith.cmpi eq, %arg1, %c0_i32 : i32
    %1 = arith.extui %0 : i1 to i32
    %c0_i32_0 = arith.constant 0 : i32
    %2 = arith.cmpi ne, %1, %c0_i32_0 : i32
    scf.if %2 {
      %cst_22 = arith.constant 0.000000e+00 : f32
      %50 = vector.broadcast %cst_22 : f32 to vector<8x128xf32>
      %c0_23 = arith.constant 0 : index
      %c0_24 = arith.constant 0 : index
      %51 = vector.load %arg5[%c0_23, %c0_24] : memref<8x128xf32, #tpu.memory_space<vmem>>, vector<8x128xf32>
      tpu.vector_store %arg5[%c0_23, %c0_24], %50 {strides = array<i32>} : memref<8x128xf32, #tpu.memory_space<vmem>>, vector<8x128xf32>,
      %cst_25 = arith.constant 0.000000e+00 : f32
      %52 = vector.broadcast %cst_25 : f32 to vector<8x128xf32>
      %c0_26 = arith.constant 0 : index
      %c0_27 = arith.constant 0 : index
      %53 = vector.load %arg6[%c0_26, %c0_27] : memref<8x128xf32, #tpu.memory_space<vmem>>, vector<8x128xf32>
      tpu.vector_store %arg6[%c0_26, %c0_27], %52 {strides = array<i32>} : memref<8x128xf32, #tpu.memory_space<vmem>>, vector<8x128xf32>,
    } else {
    }
    %c1_i32 = arith.constant 1 : i32
    %3 = arith.muli %arg0, %c1_i32 : i32
    %4 = arith.addi %3, %arg1 : i32
    %c16_i32 = arith.constant 16 : i32
    %5 = arith.muli %4, %c16_i32 : i32
    %6 = tpu.iota {dimensions = array<i32: 0>} : vector<16x1xi32>
    %7 = vector.broadcast %5 : i32 to vector<16x1xi32>
    %8 = arith.addi %7, %6 : vector<16x1xi32>
    %c2_i32 = arith.constant 2 : i32
    %9 = vector.broadcast %c2_i32 : i32 to vector<16x1xi32>
    %10 = arith.cmpi slt, %8, %9 : vector<16x1xi32>
    %c0 = arith.constant 0 : index
    %c0_1 = arith.constant 0 : index
    %11 = vector.load %arg2[%c0, %c0_1] : memref<16x128xf32, #tpu.memory_space<vmem>>, vector<16x128xf32>
    %cst = arith.constant 0.000000e+00 : f32
    %12 = vector.shape_cast %10 : vector<16x1xi1> to vector<16x1xi1>
    %13 = vector.broadcast %12 : vector<16x1xi1> to vector<16x128xi1>
    %14 = vector.broadcast %cst : f32 to vector<16x128xf32>
    %15 = arith.select %13, %11, %14 : vector<16x128xi1>, vector<16x128xf32>
    %c0_2 = arith.constant 0 : index
    %c0_3 = arith.constant 0 : index
    %16 = vector.load %arg3[%c0_2, %c0_3] : memref<16x128xf32, #tpu.memory_space<vmem>>, vector<16x128xf32>
    %cst_4 = arith.constant 0.000000e+00 : f32
    %17 = vector.shape_cast %10 : vector<16x1xi1> to vector<16x1xi1>
    %18 = vector.broadcast %17 : vector<16x1xi1> to vector<16x128xi1>
    %19 = vector.broadcast %cst_4 : f32 to vector<16x128xf32>
    %20 = arith.select %18, %16, %19 : vector<16x128xi1>, vector<16x128xf32>
    %c0_5 = arith.constant 0 : index
    %c0_6 = arith.constant 0 : index
    %21 = vector.load %arg4[%c0_5, %c0_6] : memref<128x128xf32, #tpu.memory_space<vmem>>, vector<128x128xf32>
    %cst_7 = arith.constant dense<0xFF800000> : vector<16xf32>
    %22 = vector.multi_reduction <maximumf>, %15, %cst_7 [1] : vector<16x128xf32> to vector<16xf32>
    %23 = vector.shape_cast %22 : vector<16xf32> to vector<16x1xf32>
    %24 = vector.broadcast %23 : vector<16x1xf32> to vector<16x128xf32>
    %25 = arith.subf %15, %24 : vector<16x128xf32>
    %26 = math.exp %25 : vector<16x128xf32>
    %cst_8 = arith.constant dense<0.000000e+00> : vector<16x128xf32>
    %27 = tpu.matmul %26, %21, %cst_8 {dimension_numbers = #tpu.dot_dimension_numbers<[1], [0], [0], [1], [0, 0, 1, 1], [], []>, precision = #tpu.contract_precision<fp32>} : vector<16x128xf32>, vector<128x128xf32>, vector<16x128xf32> -> vector<16x128xf32>
    %cst_9 = arith.constant 1.17549435E-38 : f32
    %28 = vector.broadcast %cst_9 : f32 to vector<16x128xf32>
    %29 = arith.maximumf %27, %28 : vector<16x128xf32>
    %30 = math.log %29 : vector<16x128xf32>
    %31 = vector.broadcast %23 : vector<16x1xf32> to vector<16x128xf32>
    %32 = arith.addf %30, %31 : vector<16x128xf32>
    %33 = arith.subf %32, %15 : vector<16x128xf32>
    %34 = arith.mulf %20, %33 : vector<16x128xf32>
    %cst_10 = arith.constant dense<0.000000e+00> : vector<16x128xf32>
    %35 = tpu.matmul %20, %21, %cst_10 {dimension_numbers = #tpu.dot_dimension_numbers<[1], [0], [0], [1], [0, 0, 1, 1], [], []>, precision = #tpu.contract_precision<fp32>} : vector<16x128xf32>, vector<128x128xf32>, vector<16x128xf32> -> vector<16x128xf32>
    %cst_11 = arith.constant 0.000000e+00 : f32
    %36 = vector.broadcast %cst_11 : f32 to vector<16x128xf32>
    %37 = arith.cmpf ogt, %35, %36 : vector<16x128xf32>
    %38 = arith.extui %37 : vector<16x128xi1> to vector<16x128xi32>
    %39 = arith.sitofp %38 : vector<16x128xi32> to vector<16x128xf32>
    %c0_12 = arith.constant 0 : index
    %c0_13 = arith.constant 0 : index
    %40 = vector.load %arg5[%c0_12, %c0_13] : memref<8x128xf32, #tpu.memory_space<vmem>>, vector<8x128xf32>
    %41 = vector.shape_cast %34 : vector<16x128xf32> to vector<2x8x128xf32>
    %cst_14 = arith.constant dense<0.000000e+00> : vector<8x128xf32>
    %42 = vector.multi_reduction <add>, %41, %cst_14 [0] : vector<2x8x128xf32> to vector<8x128xf32>
    %43 = arith.addf %40, %42 : vector<8x128xf32>
    %c0_15 = arith.constant 0 : index
    %c0_16 = arith.constant 0 : index
    %44 = vector.load %arg5[%c0_15, %c0_16] : memref<8x128xf32, #tpu.memory_space<vmem>>, vector<8x128xf32>
    tpu.vector_store %arg5[%c0_15, %c0_16], %43 {strides = array<i32>} : memref<8x128xf32, #tpu.memory_space<vmem>>, vector<8x128xf32>,
    %c0_17 = arith.constant 0 : index
    %c0_18 = arith.constant 0 : index
    %45 = vector.load %arg6[%c0_17, %c0_18] : memref<8x128xf32, #tpu.memory_space<vmem>>, vector<8x128xf32>
    %46 = vector.shape_cast %39 : vector<16x128xf32> to vector<2x8x128xf32>
    %cst_19 = arith.constant dense<0.000000e+00> : vector<8x128xf32>
    %47 = vector.multi_reduction <add>, %46, %cst_19 [0] : vector<2x8x128xf32> to vector<8x128xf32>
    %48 = arith.addf %45, %47 : vector<8x128xf32>
    %c0_20 = arith.constant 0 : index
    %c0_21 = arith.constant 0 : index
    %49 = vector.load %arg6[%c0_20, %c0_21] : memref<8x128xf32, #tpu.memory_space<vmem>>, vector<8x128xf32>
    tpu.vector_store %arg6[%c0_20, %c0_21], %48 {strides = array<i32>} : memref<8x128xf32, #tpu.memory_space<vmem>>, vector<8x128xf32>,
    return
  }
  func.func @transform_0(%arg0: i32, %arg1: i32) -> (i32, i32) {
    %c1_i32 = arith.constant 1 : i32
    %0 = arith.muli %arg0, %c1_i32 : i32
    %1 = arith.addi %0, %arg1 : i32
    %c0_i32 = arith.constant 0 : i32
    %2 = arith.minsi %1, %c0_i32 : i32
    %c0_i32_0 = arith.constant 0 : i32
    %c0_i32_1 = arith.constant 0 : i32
    return %2, %c0_i32_0 : i32, i32
  }
  func.func @transform_1(%arg0: i32, %arg1: i32) -> (i32, i32) {
    %c1_i32 = arith.constant 1 : i32
    %0 = arith.muli %arg0, %c1_i32 : i32
    %1 = arith.addi %0, %arg1 : i32
    %c0_i32 = arith.constant 0 : i32
    %2 = arith.minsi %1, %c0_i32 : i32
    %c0_i32_0 = arith.constant 0 : i32
    %c0_i32_1 = arith.constant 0 : i32
    return %2, %c0_i32_0 : i32, i32
  }
  func.func @transform_2(%arg0: i32, %arg1: i32) -> (i32, i32) {
    %c0_i32 = arith.constant 0 : i32
    %c0_i32_0 = arith.constant 0 : i32
    %c0_i32_1 = arith.constant 0 : i32
    return %c0_i32, %c0_i32_0 : i32, i32
  }
  func.func @transform_3(%arg0: i32, %arg1: i32) -> (i32, i32) {
    %c0_i32 = arith.constant 0 : i32
    %c0_i32_0 = arith.constant 0 : i32
    return %arg0, %c0_i32 : i32, i32
  }
  func.func @transform_4(%arg0: i32, %arg1: i32) -> (i32, i32) {
    %c0_i32 = arith.constant 0 : i32
    %c0_i32_0 = arith.constant 0 : i32
    return %arg0, %c0_i32 : i32, i32
  }
}

module attributes {stable_mosaic.version = 11 : i64} {
  func.func @_packed_ce_kernel(%arg0: i32, %arg1: i32, %arg2: memref<16x128xf32, #tpu.memory_space<vmem>>, %arg3: memref<16x128xf32, #tpu.memory_space<vmem>>, %arg4: memref<128x128xf32, #tpu.memory_space<vmem>>, %arg5: memref<8x128xf32, #tpu.memory_space<vmem>>, %arg6: memref<8x128xf32, #tpu.memory_space<vmem>>) attributes {dimension_semantics = [#tpu.dimension_semantics<parallel>, #tpu.dimension_semantics<arbitrary>], iteration_bounds = array<i64: 1, 1>, scalar_prefetch = 0 : i64, scratch_operands = 0 : i64, tpu.core_type = #tpu.core_type<tc>, window_params = [{transform_indices = @transform_0, window_bounds = array<i64: 16, 128>}, {transform_indices = @transform_1, window_bounds = array<i64: 16, 128>}, {pipeline_mode = #tpu.pipeline_mode<synchronous>, transform_indices = @transform_2, window_bounds = array<i64: 128, 128>}, {transform_indices = @transform_3, window_bounds = array<i64: 8, 128>}, {transform_indices = @transform_4, window_bounds = array<i64: 8, 128>}]} {
    %c0_i32 = arith.constant 0 : i32
    %0 = arith.cmpi eq, %arg1, %c0_i32 : i32
    %1 = arith.extui %0 : i1 to i32
    %c0_i32_0 = arith.constant 0 : i32
    %2 = arith.cmpi ne, %1, %c0_i32_0 : i32
    scf.if %2 {
      %cst_22 = arith.constant 0.000000e+00 : f32
      %50 = vector.broadcast %cst_22 : f32 to vector<8x128xf32>
      %c0_23 = arith.constant 0 : index
      %c0_24 = arith.constant 0 : index
      %51 = vector.load %arg5[%c0_23, %c0_24] : memref<8x128xf32, #tpu.memory_space<vmem>>, vector<8x128xf32>
      tpu.vector_store %arg5[%c0_23, %c0_24], %50 {strides = array<i32>} : memref<8x128xf32, #tpu.memory_space<vmem>>, vector<8x128xf32>,
      %cst_25 = arith.constant 0.000000e+00 : f32
      %52 = vector.broadcast %cst_25 : f32 to vector<8x128xf32>
      %c0_26 = arith.constant 0 : index
      %c0_27 = arith.constant 0 : index
      %53 = vector.load %arg6[%c0_26, %c0_27] : memref<8x128xf32, #tpu.memory_space<vmem>>, vector<8x128xf32>
      tpu.vector_store %arg6[%c0_26, %c0_27], %52 {strides = array<i32>} : memref<8x128xf32, #tpu.memory_space<vmem>>, vector<8x128xf32>,
    } else {
    }
    %c1_i32 = arith.constant 1 : i32
    %3 = arith.muli %arg0, %c1_i32 : i32
    %4 = arith.addi %3, %arg1 : i32
    %c16_i32 = arith.constant 16 : i32
    %5 = arith.muli %4, %c16_i32 : i32
    %6 = tpu.iota {dimensions = array<i32: 0>} : vector<16x1xi32>
    %7 = vector.broadcast %5 : i32 to vector<16x1xi32>
    %8 = arith.addi %7, %6 : vector<16x1xi32>
    %c10_i32 = arith.constant 10 : i32
    %9 = vector.broadcast %c10_i32 : i32 to vector<16x1xi32>
    %10 = arith.cmpi slt, %8, %9 : vector<16x1xi32>
    %c0 = arith.constant 0 : index
    %c0_1 = arith.constant 0 : index
    %11 = vector.load %arg2[%c0, %c0_1] : memref<16x128xf32, #tpu.memory_space<vmem>>, vector<16x128xf32>
    %cst = arith.constant 0.000000e+00 : f32
    %12 = vector.shape_cast %10 : vector<16x1xi1> to vector<16x1xi1>
    %13 = vector.broadcast %12 : vector<16x1xi1> to vector<16x128xi1>
    %14 = vector.broadcast %cst : f32 to vector<16x128xf32>
    %15 = arith.select %13, %11, %14 : vector<16x128xi1>, vector<16x128xf32>
    %c0_2 = arith.constant 0 : index
    %c0_3 = arith.constant 0 : index
    %16 = vector.load %arg3[%c0_2, %c0_3] : memref<16x128xf32, #tpu.memory_space<vmem>>, vector<16x128xf32>
    %cst_4 = arith.constant 0.000000e+00 : f32
    %17 = vector.shape_cast %10 : vector<16x1xi1> to vector<16x1xi1>
    %18 = vector.broadcast %17 : vector<16x1xi1> to vector<16x128xi1>
    %19 = vector.broadcast %cst_4 : f32 to vector<16x128xf32>
    %20 = arith.select %18, %16, %19 : vector<16x128xi1>, vector<16x128xf32>
    %c0_5 = arith.constant 0 : index
    %c0_6 = arith.constant 0 : index
    %21 = vector.load %arg4[%c0_5, %c0_6] : memref<128x128xf32, #tpu.memory_space<vmem>>, vector<128x128xf32>
    %cst_7 = arith.constant dense<0xFF800000> : vector<16xf32>
    %22 = vector.multi_reduction <maximumf>, %15, %cst_7 [1] : vector<16x128xf32> to vector<16xf32>
    %23 = vector.shape_cast %22 : vector<16xf32> to vector<16x1xf32>
    %24 = vector.broadcast %23 : vector<16x1xf32> to vector<16x128xf32>
    %25 = arith.subf %15, %24 : vector<16x128xf32>
    %26 = math.exp %25 : vector<16x128xf32>
    %cst_8 = arith.constant dense<0.000000e+00> : vector<16x128xf32>
    %27 = tpu.matmul %26, %21, %cst_8 {dimension_numbers = #tpu.dot_dimension_numbers<[1], [0], [0], [1], [0, 0, 1, 1], [], []>, precision = #tpu.contract_precision<fp32>} : vector<16x128xf32>, vector<128x128xf32>, vector<16x128xf32> -> vector<16x128xf32>
    %cst_9 = arith.constant 1.17549435E-38 : f32
    %28 = vector.broadcast %cst_9 : f32 to vector<16x128xf32>
    %29 = arith.maximumf %27, %28 : vector<16x128xf32>
    %30 = math.log %29 : vector<16x128xf32>
    %31 = vector.broadcast %23 : vector<16x1xf32> to vector<16x128xf32>
    %32 = arith.addf %30, %31 : vector<16x128xf32>
    %33 = arith.subf %32, %15 : vector<16x128xf32>
    %34 = arith.mulf %20, %33 : vector<16x128xf32>
    %cst_10 = arith.constant dense<0.000000e+00> : vector<16x128xf32>
    %35 = tpu.matmul %20, %21, %cst_10 {dimension_numbers = #tpu.dot_dimension_numbers<[1], [0], [0], [1], [0, 0, 1, 1], [], []>, precision = #tpu.contract_precision<fp32>} : vector<16x128xf32>, vector<128x128xf32>, vector<16x128xf32> -> vector<16x128xf32>
    %cst_11 = arith.constant 0.000000e+00 : f32
    %36 = vector.broadcast %cst_11 : f32 to vector<16x128xf32>
    %37 = arith.cmpf ogt, %35, %36 : vector<16x128xf32>
    %38 = arith.extui %37 : vector<16x128xi1> to vector<16x128xi32>
    %39 = arith.sitofp %38 : vector<16x128xi32> to vector<16x128xf32>
    %c0_12 = arith.constant 0 : index
    %c0_13 = arith.constant 0 : index
    %40 = vector.load %arg5[%c0_12, %c0_13] : memref<8x128xf32, #tpu.memory_space<vmem>>, vector<8x128xf32>
    %41 = vector.shape_cast %34 : vector<16x128xf32> to vector<2x8x128xf32>
    %cst_14 = arith.constant dense<0.000000e+00> : vector<8x128xf32>
    %42 = vector.multi_reduction <add>, %41, %cst_14 [0] : vector<2x8x128xf32> to vector<8x128xf32>
    %43 = arith.addf %40, %42 : vector<8x128xf32>
    %c0_15 = arith.constant 0 : index
    %c0_16 = arith.constant 0 : index
    %44 = vector.load %arg5[%c0_15, %c0_16] : memref<8x128xf32, #tpu.memory_space<vmem>>, vector<8x128xf32>
    tpu.vector_store %arg5[%c0_15, %c0_16], %43 {strides = array<i32>} : memref<8x128xf32, #tpu.memory_space<vmem>>, vector<8x128xf32>,
    %c0_17 = arith.constant 0 : index
    %c0_18 = arith.constant 0 : index
    %45 = vector.load %arg6[%c0_17, %c0_18] : memref<8x128xf32, #tpu.memory_space<vmem>>, vector<8x128xf32>
    %46 = vector.shape_cast %39 : vector<16x128xf32> to vector<2x8x128xf32>
    %cst_19 = arith.constant dense<0.000000e+00> : vector<8x128xf32>
    %47 = vector.multi_reduction <add>, %46, %cst_19 [0] : vector<2x8x128xf32> to vector<8x128xf32>
    %48 = arith.addf %45, %47 : vector<8x128xf32>
    %c0_20 = arith.constant 0 : index
    %c0_21 = arith.constant 0 : index
    %49 = vector.load %arg6[%c0_20, %c0_21] : memref<8x128xf32, #tpu.memory_space<vmem>>, vector<8x128xf32>
    tpu.vector_store %arg6[%c0_20, %c0_21], %48 {strides = array<i32>} : memref<8x128xf32, #tpu.memory_space<vmem>>, vector<8x128xf32>,
    return
  }
  func.func @transform_0(%arg0: i32, %arg1: i32) -> (i32, i32) {
    %c1_i32 = arith.constant 1 : i32
    %0 = arith.muli %arg0, %c1_i32 : i32
    %1 = arith.addi %0, %arg1 : i32
    %c0_i32 = arith.constant 0 : i32
    %2 = arith.minsi %1, %c0_i32 : i32
    %c0_i32_0 = arith.constant 0 : i32
    %c0_i32_1 = arith.constant 0 : i32
    return %2, %c0_i32_0 : i32, i32
  }
  func.func @transform_1(%arg0: i32, %arg1: i32) -> (i32, i32) {
    %c1_i32 = arith.constant 1 : i32
    %0 = arith.muli %arg0, %c1_i32 : i32
    %1 = arith.addi %0, %arg1 : i32
    %c0_i32 = arith.constant 0 : i32
    %2 = arith.minsi %1, %c0_i32 : i32
    %c0_i32_0 = arith.constant 0 : i32
    %c0_i32_1 = arith.constant 0 : i32
    return %2, %c0_i32_0 : i32, i32
  }
  func.func @transform_2(%arg0: i32, %arg1: i32) -> (i32, i32) {
    %c0_i32 = arith.constant 0 : i32
    %c0_i32_0 = arith.constant 0 : i32
    %c0_i32_1 = arith.constant 0 : i32
    return %c0_i32, %c0_i32_0 : i32, i32
  }
  func.func @transform_3(%arg0: i32, %arg1: i32) -> (i32, i32) {
    %c0_i32 = arith.constant 0 : i32
    %c0_i32_0 = arith.constant 0 : i32
    return %arg0, %c0_i32 : i32, i32
  }
  func.func @transform_4(%arg0: i32, %arg1: i32) -> (i32, i32) {
    %c0_i32 = arith.constant 0 : i32
    %c0_i32_0 = arith.constant 0 : i32
    return %arg0, %c0_i32 : i32, i32
  }
}

</mosaic_0001>

<bundles_post_ra>
// kernel: train_ce_metrics.2
= control target key start
LH: loop header
LB: loop body
LE: loop exit
PB: predicated region body
PF: predicated region fallthrough
CT: control target
= control target key end

     0   :  { %v108_v0 = vlaneseq  ;;  %v2619_v29 = vmov 0.0   ;;  %s3133_s2 = inlined_call_operand.vmem [shape: f32[128,128], index: 2, kind: input, shape index: {}]   ;;  %s3134_s0 = inlined_call_operand.vmem [shape: f32[2,128], index: 0, kind: input, shape index: {}]   ;;  %s3135_s1 = inlined_call_operand.vmem [shape: f32[2,128], index: 1, kind: input, shape index: {}]   ;;  %s3136_s4 = inlined_call_operand.vmem [shape: f32[8,128], index: 4, kind: output, shape index: {1}]   ;;  %s3137_s3 = inlined_call_operand.vmem [shape: f32[8,128], index: 3, kind: output, shape index: {0}]  }
   0x1   :  { %v128_v1 = vld [vmem:[%s3133_s2] sm:$0xff]  ;;  %v129_v2 = vld [vmem:[%s3133_s2 + $0x8] sm:$0xff]  ;;  %v130_v8 = vld [vmem:[%s3133_s2 + $0x10] sm:$0xff] }
   0x2   :  { %v116_v3 = vld [vmem:[%s3134_s0] sm:$0xff]  ;;  %v155_v4 = vand.u32 4294901760, %v128_v1  ;;  %v158_v5 = vand.u32 4294901760, %v129_v2  ;;  %v109_v6 = vshrl.u32 %v108_v0, 7  ;;  %v2663_v9 = vld [vmem:[%s3133_s2 + $0x18] sm:$0xff]  ;;  %v161_v10 = vand.u32 4294901760, %v130_v8 }
   0x3   :  { %v124_v7 = vld [vmem:[%s3135_s1] sm:$0xff]  ;;  %v164_v11 = vand.u32 4294901760, %v2663_v9  ;;  %v2674_v13 = vld [vmem:[%s3133_s2 + $0x28] sm:$0xff]  ;;  %v2691_v20 = vld [vmem:[%s3133_s2 + $0x30] sm:$0xff] }
   0x4   :  { %v2669_v12 = vld [vmem:[%s3133_s2 + $0x20] sm:$0xff]  ;;  %v2676_v14 = vpack.c.bf16 %v158_v5, %v155_v4  ;;  %vm114_vm0 = vcmp.lt.s32.totalorder %v109_v6, 2  ;;  %v170_v16 = vand.u32 4294901760, %v2674_v13  ;;  %v2696_v21 = vld [vmem:[%s3133_s2 + $0x38] sm:$0xff]  ;;  %v173_v24 = vand.u32 4294901760, %v2691_v20  ;;  %v137_v27 = vld [vmem:[%s3133_s2 + $0x48] sm:$0xff] }
   0x5   :  { %v167_v15 = vand.u32 4294901760, %v2669_v12  ;;  %v2680_v17 = vsel %vm114_vm0, %v116_v3, 0.0  ;;  %v2682_v18 = vsel %vm114_vm0, %v124_v7, 0.0  ;;  %v2686_v19 = vpack.c.bf16 %v164_v11, %v161_v10  ;;  %v136_v26 = vld [vmem:[%s3133_s2 + $0x40] sm:$0xff]  ;;  %v138_v34 = vld [vmem:[%s3133_s2 + $0x50] sm:$0xff]  ;;  %v139_v35 = vld [vmem:[%s3133_s2 + $0x58] sm:$0xff] }
   0x6   :  { %2399 = vmatprep.subr.bf16.mxu1 %v2676_v14  ;;  %v2700_v22 = vand.u32 4294901760, %v2682_v18  ;;  %144 = vmax.xlane.f32.xlu0 %v2680_v17  ;;  %v176_v25 = vand.u32 4294901760, %v2696_v21  ;;  %v179_v32 = vand.u32 4294901760, %v136_v26  ;;  %v182_v33 = vand.u32 4294901760, %v137_v27  ;;  %v140_v37 = vld [vmem:[%s3133_s2 + $0x60] sm:$0xff]  ;;  %v141_v39 = vld [vmem:[%s3133_s2 + $0x68] sm:$0xff] }
   0x7   :  { %2401 = vmatpush3.bf16.msra.mxu1 %v2676_v14  ;;  %2207 = vmatprep.subr.bf16.mxu0 %v2676_v14  ;;  %v2706_v23 = vpack.c.bf16 %v170_v16, %v167_v15  ;;  %v2742_v38 = vsub.f32 %v128_v1, %v155_v4  ;;  %v142_v40 = vld [vmem:[%s3133_s2 + $0x70] sm:$0xff]  ;;  %v143_v41 = vld [vmem:[%s3133_s2 + $0x78] sm:$0xff]  ;;  %v2754_v43 = vsub.f32 %v129_v2, %v158_v5  ;;  %v185_v46 = vand.u32 4294901760, %v138_v34 }
   0x8   :  { %2403 = vmatprep.subr.bf16.mxu1 %v2686_v19  ;;  %2209 = vmatpush3.bf16.msra.mxu0 %v2676_v14  ;;  %v2719_v28 = vsub.f32 %v2682_v18, %v2700_v22  ;;  %v2726_v31 = vpack.c.bf16 %v176_v25, %v173_v24  ;;  %v2756_v44 = vsub.f32 %v130_v8, %v161_v10  ;;  %v188_v47 = vand.u32 4294901760, %v139_v35 }
   0x9   :  { %2211 = vmatprep.subr.bf16.mxu0 %v2686_v19  ;;  %v2759_v45 = vpack.c.bf16 %v182_v33, %v179_v32  ;;  %v191_v48 = vand.u32 4294901760, %v140_v37  ;;  %v194_v49 = vand.u32 4294901760, %v141_v39  ;;  %v197_v50 = vand.u32 4294901760, %v142_v40 }
   0xa   :  { %146 = vmax.xlane.f32.xlu0 %v2619_v29  ;;  %v933_v30 = vand.u32 4294901760, %v2719_v28  ;;  %v200_v51 = vand.u32 4294901760, %v143_v41  ;;  %v258_v52 = vand.u32 4294901760, %v2742_v38  ;;  %v265_v53 = vand.u32 4294901760, %v2754_v43 }
   0xb   :  { %2405 = vmatpush3.bf16.msra.mxu1 %v2686_v19  ;;  %v272_v54 = vand.u32 4294901760, %v2756_v44  ;;  %v2770_v55 = vsub.f32 %v2663_v9, %v164_v11  ;;  %v2773_v56 = vsub.f32 %v2669_v12, %v167_v15  ;;  %v2776_v57 = vpack.c.bf16 %v188_v47, %v185_v46 }
   0xc   :  { %2407 = vmatprep.subr.bf16.mxu1 %v2706_v23  ;;  %2213 = vmatpush3.bf16.msra.mxu0 %v2686_v19  ;;  %v934_v36 = vsub.f32 %v2719_v28, %v933_v30  ;;  %v2779_v58 = vsub.f32 %v2674_v13, %v170_v16  ;;  %v2783_v59 = vpack.c.bf16 %v194_v49, %v191_v48 }
   0xd   :  { %2215 = vmatprep.subr.bf16.mxu0 %v2706_v23  ;;  %v2785_v60 = vpack.c.bf16 %v200_v51, %v197_v50  ;;  %v259_v61 = vsub.f32 %v2742_v38, %v258_v52  ;;  %v2789_v62 = vsub.f32 %v2691_v20, %v173_v24  ;;  %v266_v63 = vsub.f32 %v2754_v43, %v265_v53 }
   0xe   :  { %v935_v42 = vand.u32 4294901760, %v934_v36  ;;  %v273_v0 = vsub.f32 %v2756_v44, %v272_v54  ;;  %v279_v1 = vand.u32 4294901760, %v2770_v55  ;;  %v286_v2 = vand.u32 4294901760, %v2773_v56 }
   0xf   :  { %2409 = vmatpush3.bf16.msra.mxu1 %v2706_v23  ;;  %v293_v3 = vand.u32 4294901760, %v2779_v58  ;;  %v2799_v4 = vsub.f32 %v2696_v21, %v176_v25  ;;  %v2801_v5 = vsub.f32 %v136_v26, %v179_v32  ;;  %v2803_v6 = vsub.f32 %v137_v27, %v182_v33 }
  0x10   :  { %2411 = vmatprep.subr.bf16.mxu1 %v2726_v31  ;;  %2217 = vmatpush3.bf16.msra.mxu0 %v2706_v23  ;;  %v2806_v7 = vsub.f32 %v138_v34, %v185_v46  ;;  %v2808_v8 = vsub.f32 %v139_v35, %v188_v47  ;;  %v2810_v9 = vsub.f32 %v140_v37, %v191_v48  ;;  %v260_v11 = vand.u32 4294901760, %v259_v61 }
  0x11   :  { %2028 = vmatprep.mubr.f32.mxu1 %v935_v42  ;;  %2219 = vmatprep.subr.bf16.mxu0 %v2726_v31  ;;  %v2812_v10 = vsub.f32 %v141_v39, %v194_v49  ;;  %v300_v12 = vand.u32 4294901760, %v2789_v62  ;;  %v2816_v13 = vsub.f32 %v142_v40, %v197_v50  ;;  %v2818_v15 = vsub.f32 %v143_v41, %v200_v51 }
  0x12   :  { %v267_v16 = vand.u32 4294901760, %v266_v63  ;;  %v274_v20 = vand.u32 4294901760, %v273_v0  ;;  %v280_v21 = vsub.f32 %v2770_v55, %v279_v1  ;;  %v287_v24 = vsub.f32 %v2773_v56, %v286_v2 }
  0x13   :  { %2413 = vmatpush3.bf16.msra.mxu1 %v2726_v31  ;;  %v294_v25 = vsub.f32 %v2779_v58, %v293_v3  ;;  %v307_v26 = vand.u32 4294901760, %v2799_v4  ;;  %v314_v27 = vand.u32 4294901760, %v2801_v5  ;;  %v321_v32 = vand.u32 4294901760, %v2803_v6 }
  0x14   :  { %2415 = vmatprep.subr.bf16.mxu1 %v2759_v45  ;;  %2221 = vmatpush3.bf16.msra.mxu0 %v2726_v31  ;;  %v328_v33 = vand.u32 4294901760, %v2806_v7  ;;  %v335_v34 = vand.u32 4294901760, %v2808_v8  ;;  %v342_v35 = vand.u32 4294901760, %v2810_v9  ;;  %v349_v36 = vand.u32 4294901760, %v2812_v10 }
  0x15   :  { %2223 = vmatprep.subr.bf16.mxu0 %v2759_v45  ;;  %v356_v37 = vand.u32 4294901760, %v2816_v13  ;;  %v363_v39 = vand.u32 4294901760, %v2818_v15  ;;  %v2836_v40 = vpack.c.bf16 %v265_v53, %v258_v52  ;;  %v2838_v41 = vpack.c.bf16 %v279_v1, %v272_v54 }
  0x16   :  { %v2841_v42 = vpack.c.bf16 %v267_v16, %v260_v11  ;;  %v2843_v46 = vpack.c.bf16 %v293_v3, %v286_v2  ;;  %v2845_v47 = vpack.c.bf16 %v307_v26, %v300_v12  ;;  %v2847_v48 = vpack.c.bf16 %v321_v32, %v314_v27 }
  0x17   :  { %2417 = vmatpush3.bf16.msra.mxu1 %v2759_v45  ;;  %v281_v49 = vand.u32 4294901760, %v280_v21  ;;  %v2850_v50 = vpack.c.bf16 %v335_v34, %v328_v33  ;;  %v2852_v51 = vpack.c.bf16 %v349_v36, %v342_v35  ;;  %v2854_v52 = vpack.c.bf16 %v363_v39, %v356_v37 }
  0x18   :  { %2419 = vmatprep.subr.bf16.mxu1 %v2776_v57  ;;  %2225 = vmatpush3.bf16.msra.mxu0 %v2759_v45  ;;  %v301_v53 = vsub.f32 %v2789_v62, %v300_v12  ;;  %v288_v61 = vand.u32 4294901760, %v287_v24  ;;  %v295_v63 = vand.u32 4294901760, %v294_v25  ;;  %v308_v0 = vsub.f32 %v2799_v4, %v307_v26 }
  0x19   :  { %2227 = vmatprep.subr.bf16.mxu0 %v2776_v57  ;;  %v2861_v54 = vpack.c.bf16 %v281_v49, %v274_v20  ;;  %v315_v1 = vsub.f32 %v2801_v5, %v314_v27  ;;  %v322_v12 = vsub.f32 %v2803_v6, %v321_v32  ;;  %v329_v24 = vsub.f32 %v2806_v7, %v328_v33 }
  0x1a   :  { %v2871_v2 = vpack.c.bf16 %v295_v63, %v288_v61  ;;  %v302_v3 = vand.u32 4294901760, %v301_v53  ;;  %v309_v11 = vand.u32 4294901760, %v308_v0  ;;  %v336_v25 = vsub.f32 %v2808_v8, %v335_v34 }
  0x1b   :  { %2421 = vmatpush3.bf16.msra.mxu1 %v2776_v57  ;;  %v316_v16 = vand.u32 4294901760, %v315_v1  ;;  %v323_v21 = vand.u32 4294901760, %v322_v12  ;;  %v343_v26 = vsub.f32 %v2810_v9, %v342_v35  ;;  %v330_v32 = vand.u32 4294901760, %v329_v24 }
  0x1c   :  { %2423 = vmatprep.subr.bf16.mxu1 %v2783_v59  ;;  %2229 = vmatpush3.bf16.msra.mxu0 %v2776_v57  ;;  %v2876_v20 = vpack.c.bf16 %v309_v11, %v302_v3  ;;  %v337_v49 = vand.u32 4294901760, %v336_v25  ;;  %v350_v53 = vsub.f32 %v2812_v10, %v349_v36  ;;  %v357_v63 = vsub.f32 %v2816_v13, %v356_v37 }
  0x1d   :  { %2231 = vmatprep.subr.bf16.mxu0 %v2783_v59  ;;  %v2883_v27 = vpack.c.bf16 %v323_v21, %v316_v16  ;;  %v344_v61 = vand.u32 4294901760, %v343_v26  ;;  %v364_v35 = vsub.f32 %v2818_v15, %v363_v39  ;;  %v2904_v37 = vpack.c.bf16 %v2754_v43, %v2742_v38 }
  0x1e   :  { %v2888_v33 = vpack.c.bf16 %v337_v49, %v330_v32  ;;  %v351_v34 = vand.u32 4294901760, %v350_v53  ;;  %v358_v1 = vand.u32 4294901760, %v357_v63  ;;  %v2910_v39 = vpack.c.bf16 %v2770_v55, %v2756_v44 }
  0x1f   :  { %2425 = vmatpush3.bf16.msra.mxu1 %v2783_v59  ;;  %v365_v36 = vand.u32 4294901760, %v364_v35  ;;  %v2918_v38 = vpack.c.bf16 %v2779_v58, %v2773_v56  ;;  %v2924_v43 = vpack.c.bf16 %v2799_v4, %v2789_v62  ;;  %v2930_v44 = vpack.c.bf16 %v2803_v6, %v2801_v5 }
  0x20   :  { %2427 = vmatprep.subr.bf16.mxu1 %v2785_v60  ;;  %2233 = vmatpush3.bf16.msra.mxu0 %v2783_v59  ;;  %v2894_v0 = vpack.c.bf16 %v351_v34, %v344_v61  ;;  %v2936_v55 = vpack.c.bf16 %v2808_v8, %v2806_v7  ;;  %v2942_v56 = vpack.c.bf16 %v2812_v10, %v2810_v9 }
  0x21   :  { %2235 = vmatprep.subr.bf16.mxu0 %v2785_v60  ;;  %v2898_v3 = vpack.c.bf16 %v365_v36, %v358_v1  ;;  %v2948_v58 = vpack.c.bf16 %v2818_v15, %v2816_v13 }
  0x23   :  { %2429 = vmatpush3.bf16.msra.mxu1 %v2785_v60 }
  0x24   :  { %2431 = vmatprep.subr.bf16.mxu1 %v2841_v42  ;;  %2237 = vmatpush3.bf16.msra.mxu0 %v2785_v60 }
  0x25   :  { %2239 = vmatprep.subr.bf16.mxu0 %v2841_v42 }
  0x26   :  { %2029 = vmatmul.mubr.f32.vlgmr.msra.gmra.mrb[0].mxu1 %v2619_v29 }
  0x27   :  { %2433 = vmatpush3.bf16.msra.mxu1 %v2841_v42  ;;  %2063 = vmatprep.mubr.f32.mxu1 %v2700_v22 }
  0x28   :  { %2435 = vmatprep.subr.bf16.mxu1 %v2861_v54 }
  0x2b   :  { %2437 = vmatpush3.bf16.msra.mxu1 %v2861_v54 }
  0x2c   :  { %2439 = vmatprep.subr.bf16.mxu1 %v2871_v2 }
  0x2f   :  { %2441 = vmatpush3.bf16.msra.mxu1 %v2871_v2 }
  0x30   :  { %2443 = vmatprep.subr.bf16.mxu1 %v2876_v20 }
  0x33   :  { %2445 = vmatpush3.bf16.msra.mxu1 %v2876_v20 }
  0x34   :  { %2447 = vmatprep.subr.bf16.mxu1 %v2883_v27 }
  0x37   :  { %2449 = vmatpush3.bf16.msra.mxu1 %v2883_v27 }
  0x38   :  { %2451 = vmatprep.subr.bf16.mxu1 %v2888_v33 }
  0x3b   :  { %2453 = vmatpush3.bf16.msra.mxu1 %v2888_v33 }
  0x3c   :  { %2455 = vmatprep.subr.bf16.mxu1 %v2894_v0 }
  0x3f   :  { %2457 = vmatpush3.bf16.msra.mxu1 %v2894_v0 }
  0x40   :  { %2459 = vmatprep.subr.bf16.mxu1 %v2898_v3 }
  0x43   :  { %2461 = vmatpush3.bf16.msra.mxu1 %v2898_v3 }
  0x44   :  { %2463 = vmatprep.subr.bf16.mxu1 %v2904_v37 }
  0x46   :  { %2064 = vmatmul.mubr.f32.vlgmr.msra.gmra.mrb[0].mxu1 %v2619_v29 }
  0x47   :  { %2465 = vmatpush3.bf16.msra.mxu1 %v2904_v37  ;;  %2098 = vmatprep.mubr.f32.mxu1 %v2719_v28 }
  0x48   :  { %2467 = vmatprep.subr.bf16.mxu1 %v2910_v39 }
  0x4b   :  { %2469 = vmatpush3.bf16.msra.mxu1 %v2910_v39 }
  0x4c   :  { %2471 = vmatprep.subr.bf16.mxu1 %v2918_v38 }
  0x4f   :  { %2473 = vmatpush3.bf16.msra.mxu1 %v2918_v38 }
  0x50   :  { %2475 = vmatprep.subr.bf16.mxu1 %v2924_v43 }
  0x53   :  { %2477 = vmatpush3.bf16.msra.mxu1 %v2924_v43 }
  0x54   :  { %2479 = vmatprep.subr.bf16.mxu1 %v2930_v44 }
  0x57   :  { %2481 = vmatpush3.bf16.msra.mxu1 %v2930_v44 }
  0x58   :  { %2483 = vmatprep.subr.bf16.mxu1 %v2936_v55 }
  0x5b   :  { %2485 = vmatpush3.bf16.msra.mxu1 %v2936_v55 }
  0x5c   :  { %2487 = vmatprep.subr.bf16.mxu1 %v2942_v56 }
  0x5f   :  { %2489 = vmatpush3.bf16.msra.mxu1 %v2942_v56 }
  0x60   :  { %2491 = vmatprep.subr.bf16.mxu1 %v2948_v58 }
  0x63   :  { %2493 = vmatpush3.bf16.msra.mxu1 %v2948_v58 }
  0x64   :  { %2495 = vmatprep.subr.bf16.mxu1 %v2676_v14 }
  0x66   :  { %2099 = vmatmul.mubr.f32.vlgmr.msra.gmra.mrb[0].mxu1 %v2619_v29 }
  0x67   :  { %2497 = vmatpush3.bf16.msra.mxu1 %v2676_v14  ;;  %2133 = vmatprep.mubr.f32.mxu1 %v933_v30 }
  0x68   :  { %2499 = vmatprep.subr.bf16.mxu1 %v2686_v19 }
  0x6b   :  { %2501 = vmatpush3.bf16.msra.mxu1 %v2686_v19 }
  0x6c   :  { %2503 = vmatprep.subr.bf16.mxu1 %v2706_v23 }
  0x6f   :  { %2505 = vmatpush3.bf16.msra.mxu1 %v2706_v23 }
  0x70   :  { %2507 = vmatprep.subr.bf16.mxu1 %v2726_v31 }
  0x73   :  { %2509 = vmatpush3.bf16.msra.mxu1 %v2726_v31 }
  0x74   :  { %2511 = vmatprep.subr.bf16.mxu1 %v2759_v45 }
  0x77   :  { %2513 = vmatpush3.bf16.msra.mxu1 %v2759_v45 }
  0x78   :  { %2515 = vmatprep.subr.bf16.mxu1 %v2776_v57 }
  0x7b   :  { %2517 = vmatpush3.bf16.msra.mxu1 %v2776_v57 }
  0x7c   :  { %2519 = vmatprep.subr.bf16.mxu1 %v2783_v59 }
  0x7f   :  { %2521 = vmatpush3.bf16.msra.mxu1 %v2783_v59 }
  0x80   :  { %2523 = vmatprep.subr.bf16.mxu1 %v2785_v60 }
  0x83   :  { %2525 = vmatpush3.bf16.msra.mxu1 %v2785_v60 }
  0x84   :  { %2527 = vmatprep.subr.bf16.mxu1 %v2836_v40 }
  0x86   :  { %2134 = vmatmul.mubr.f32.vlgmr.msra.gmra.mrb[0].mxu1 %v2619_v29 }
  0x87   :  { %2529 = vmatpush3.bf16.msra.mxu1 %v2836_v40  ;;  %2168 = vmatprep.mubr.f32.mxu1 %v2700_v22 }
  0x88   :  { %2531 = vmatprep.subr.bf16.mxu1 %v2838_v41 }
  0x8b   :  { %2533 = vmatpush3.bf16.msra.mxu1 %v2838_v41 }
  0x8c   :  { %2535 = vmatprep.subr.bf16.mxu1 %v2843_v46 }
  0x8f   :  { %2537 = vmatpush3.bf16.msra.mxu1 %v2843_v46 }
  0x90   :  { %2539 = vmatprep.subr.bf16.mxu1 %v2845_v47 }
  0x93   :  { %2541 = vmatpush3.bf16.msra.mxu1 %v2845_v47  ;;  %v2982_v28 = vpop.xlane.xlu0 %144 }
  0x94   :  { %v148_v30 = vsub.f32 %v2680_v17, %v2982_v28  ;;  %2543 = vmatprep.subr.bf16.mxu1 %v2847_v48 }
  0x96   :  { %v150_v62 = vmul.f32 1.442695, %v148_v30 }
  0x97   :  { %2545 = vmatpush3.bf16.msra.mxu1 %v2847_v48  ;;  %v2988_v4 = vpop.xlane.xlu0 %146 }
  0x98   :  { %2611 = vpow2.f32 %v150_v62  ;;  %v149_v5 = vsub.f32 0.0, %v2988_v4  ;;  %2547 = vmatprep.subr.bf16.mxu1 %v2850_v50 }
  0x9a   :  { %v152_v6 = vmul.f32 1.442695, %v149_v5 }
  0x9b   :  { %2549 = vmatpush3.bf16.msra.mxu1 %v2850_v50 }
  0x9c   :  { %2613 = vpow2.f32 %v152_v6  ;;  %2551 = vmatprep.subr.bf16.mxu1 %v2852_v51 }
  0x9f   :  { %2553 = vmatpush3.bf16.msra.mxu1 %v2852_v51 }
  0xa0   :  { %2555 = vmatprep.subr.bf16.mxu1 %v2854_v52 }
  0xa2   :  { %v2612_v7 = vpop.eup %2611 }
  0xa3   :  { %2557 = vmatpush3.bf16.msra.mxu1 %v2854_v52  ;;  %v2997_v8 = vand.u32 4294901760, %v2612_v7 }
  0xa4   :  { %2559 = vmatprep.subr.bf16.mxu1 %v2676_v14 }
  0xa5   :  { %v3001_v9 = vsub.f32 %v2612_v7, %v2997_v8 }
  0xa6   :  { %v2614_v10 = vpop.eup %2613  ;;  %2169 = vmatmul.mubr.f32.vlgmr.msra.gmra.mrb[0].mxu1 %v2619_v29 }
  0xa7   :  { %v3004_v13 = vand.u32 4294901760, %v2614_v10  ;;  %2561 = vmatpush3.bf16.msra.mxu1 %v2676_v14  ;;  %v237_v15 = vand.u32 4294901760, %v3001_v9  ;;  %2203 = vmatprep.mubr.f32.mxu1 %v2700_v22 }
  0xa8   :  { %2563 = vmatprep.subr.bf16.mxu1 %v2686_v19 }
  0xa9   :  { %v238_v11 = vsub.f32 %v3001_v9, %v237_v15  ;;  %v3012_v12 = vsub.f32 %v2614_v10, %v3004_v13 }
  0xab   :  { %2565 = vmatpush3.bf16.msra.mxu1 %v2686_v19  ;;  %v239_v16 = vand.u32 4294901760, %v238_v11  ;;  %v247_v21 = vand.u32 4294901760, %v3012_v12 }
  0xac   :  { %2567 = vmatprep.subr.bf16.mxu1 %v2706_v23 }
  0xad   :  { %1818 = vmatprep.mubr.f32.mxu0 %v239_v16  ;;  %v248_v24 = vsub.f32 %v3012_v12, %v247_v21 }
  0xaf   :  { %2569 = vmatpush3.bf16.msra.mxu1 %v2706_v23  ;;  %v249_v22 = vand.u32 4294901760, %v248_v24 }
  0xb0   :  { %2571 = vmatprep.subr.bf16.mxu1 %v2726_v31 }
  0xb1   :  { %1819 = vmatmul.mubr.f32.vlgmr.msra.gmra.mrb[0].mxu0 %v249_v22 }
  0xb2   :  { %2241 = vmatpush3.bf16.msra.mxu0 %v2841_v42  ;;  %1853 = vmatprep.mubr.f32.mxu0 %v2997_v8 }
  0xb3   :  { %2573 = vmatpush3.bf16.msra.mxu1 %v2726_v31  ;;  %2243 = vmatprep.subr.bf16.mxu0 %v2861_v54 }
  0xb4   :  { %2575 = vmatprep.subr.bf16.mxu1 %v2759_v45 }
  0xb6   :  { %2245 = vmatpush3.bf16.msra.mxu0 %v2861_v54 }
  0xb7   :  { %2577 = vmatpush3.bf16.msra.mxu1 %v2759_v45  ;;  %2247 = vmatprep.subr.bf16.mxu0 %v2871_v2 }
  0xb8   :  { %2579 = vmatprep.subr.bf16.mxu1 %v2776_v57 }
  0xba   :  { %2249 = vmatpush3.bf16.msra.mxu0 %v2871_v2 }
  0xbb   :  { %2581 = vmatpush3.bf16.msra.mxu1 %v2776_v57  ;;  %2251 = vmatprep.subr.bf16.mxu0 %v2876_v20 }
  0xbc   :  { %2583 = vmatprep.subr.bf16.mxu1 %v2783_v59 }
  0xbe   :  { %2253 = vmatpush3.bf16.msra.mxu0 %v2876_v20 }
  0xbf   :  { %2585 = vmatpush3.bf16.msra.mxu1 %v2783_v59  ;;  %2255 = vmatprep.subr.bf16.mxu0 %v2883_v27 }
  0xc0   :  { %2587 = vmatprep.subr.bf16.mxu1 %v2785_v60 }
  0xc2   :  { %2257 = vmatpush3.bf16.msra.mxu0 %v2883_v27 }
  0xc3   :  { %2589 = vmatpush3.bf16.msra.mxu1 %v2785_v60  ;;  %2259 = vmatprep.subr.bf16.mxu0 %v2888_v33 }
  0xc6   :  { %2261 = vmatpush3.bf16.msra.mxu0 %v2888_v33  ;;  %2204 = vmatmul.mubr.f32.vlgmr.msra.gmra.mrb[0].mxu1 %v2619_v29 }
  0xc7   :  { %2263 = vmatprep.subr.bf16.mxu0 %v2894_v0 }
  0xca   :  { %2265 = vmatpush3.bf16.msra.mxu0 %v2894_v0 }
  0xcb   :  { %2267 = vmatprep.subr.bf16.mxu0 %v2898_v3 }
  0xce   :  { %2269 = vmatpush3.bf16.msra.mxu0 %v2898_v3 }
  0xcf   :  { %2271 = vmatprep.subr.bf16.mxu0 %v2904_v37 }
  0xd1   :  { %1854 = vmatmul.mubr.f32.vlgmr.msra.gmra.mrb[0].mxu0 %v3004_v13 }
  0xd2   :  { %2273 = vmatpush3.bf16.msra.mxu0 %v2904_v37  ;;  %1888 = vmatprep.mubr.f32.mxu0 %v3001_v9 }
  0xd3   :  { %2275 = vmatprep.subr.bf16.mxu0 %v2910_v39 }
  0xd6   :  { %2277 = vmatpush3.bf16.msra.mxu0 %v2910_v39 }
  0xd7   :  { %2279 = vmatprep.subr.bf16.mxu0 %v2918_v38 }
  0xda   :  { %2281 = vmatpush3.bf16.msra.mxu0 %v2918_v38 }
  0xdb   :  { %2283 = vmatprep.subr.bf16.mxu0 %v2924_v43 }
  0xde   :  { %2285 = vmatpush3.bf16.msra.mxu0 %v2924_v43 }
  0xdf   :  { %2287 = vmatprep.subr.bf16.mxu0 %v2930_v44 }
  0xe2   :  { %2289 = vmatpush3.bf16.msra.mxu0 %v2930_v44 }
  0xe3   :  { %2291 = vmatprep.subr.bf16.mxu0 %v2936_v55 }
  0xe6   :  { %2293 = vmatpush3.bf16.msra.mxu0 %v2936_v55 }
  0xe7   :  { %2295 = vmatprep.subr.bf16.mxu0 %v2942_v56 }
  0xea   :  { %2297 = vmatpush3.bf16.msra.mxu0 %v2942_v56 }
  0xeb   :  { %2299 = vmatprep.subr.bf16.mxu0 %v2948_v58 }
  0xee   :  { %2301 = vmatpush3.bf16.msra.mxu0 %v2948_v58 }
  0xef   :  { %2303 = vmatprep.subr.bf16.mxu0 %v2676_v14 }
  0xf1   :  { %1889 = vmatmul.mubr.f32.vlgmr.msra.gmra.mrb[0].mxu0 %v3012_v12 }
  0xf2   :  { %2305 = vmatpush3.bf16.msra.mxu0 %v2676_v14  ;;  %1923 = vmatprep.mubr.f32.mxu0 %v237_v15 }
  0xf3   :  { %2307 = vmatprep.subr.bf16.mxu0 %v2686_v19 }
  0xf6   :  { %2309 = vmatpush3.bf16.msra.mxu0 %v2686_v19 }
  0xf7   :  { %2311 = vmatprep.subr.bf16.mxu0 %v2706_v23 }
  0xfa   :  { %2313 = vmatpush3.bf16.msra.mxu0 %v2706_v23 }
  0xfb   :  { %2315 = vmatprep.subr.bf16.mxu0 %v2726_v31 }
  0xfe   :  { %2317 = vmatpush3.bf16.msra.mxu0 %v2726_v31 }
  0xff   :  { %2319 = vmatprep.subr.bf16.mxu0 %v2759_v45 }
 0x102   :  { %2321 = vmatpush3.bf16.msra.mxu0 %v2759_v45 }
 0x103   :  { %2323 = vmatprep.subr.bf16.mxu0 %v2776_v57 }
 0x106   :  { %2325 = vmatpush3.bf16.msra.mxu0 %v2776_v57 }
 0x107   :  { %2327 = vmatprep.subr.bf16.mxu0 %v2783_v59 }
 0x10a   :  { %2329 = vmatpush3.bf16.msra.mxu0 %v2783_v59 }
 0x10b   :  { %2331 = vmatprep.subr.bf16.mxu0 %v2785_v60 }
 0x10e   :  { %2333 = vmatpush3.bf16.msra.mxu0 %v2785_v60 }
 0x10f   :  { %2335 = vmatprep.subr.bf16.mxu0 %v2836_v40 }
 0x111   :  { %1924 = vmatmul.mubr.f32.vlgmr.msra.gmra.mrb[0].mxu0 %v247_v21 }
 0x112   :  { %2337 = vmatpush3.bf16.msra.mxu0 %v2836_v40  ;;  %1958 = vmatprep.mubr.f32.mxu0 %v2997_v8 }
 0x113   :  { %2339 = vmatprep.subr.bf16.mxu0 %v2838_v41 }
 0x116   :  { %2341 = vmatpush3.bf16.msra.mxu0 %v2838_v41 }
 0x117   :  { %2343 = vmatprep.subr.bf16.mxu0 %v2843_v46 }
 0x11a   :  { %2345 = vmatpush3.bf16.msra.mxu0 %v2843_v46 }
 0x11b   :  { %2347 = vmatprep.subr.bf16.mxu0 %v2845_v47 }
 0x11e   :  { %2349 = vmatpush3.bf16.msra.mxu0 %v2845_v47 }
 0x11f   :  { %2351 = vmatprep.subr.bf16.mxu0 %v2847_v48 }
 0x122   :  { %2353 = vmatpush3.bf16.msra.mxu0 %v2847_v48 }
 0x123   :  { %2355 = vmatprep.subr.bf16.mxu0 %v2850_v50 }
 0x126   :  { %2357 = vmatpush3.bf16.msra.mxu0 %v2850_v50 }
 0x127   :  { %2359 = vmatprep.subr.bf16.mxu0 %v2852_v51 }
 0x12a   :  { %2361 = vmatpush3.bf16.msra.mxu0 %v2852_v51 }
 0x12b   :  { %2363 = vmatprep.subr.bf16.mxu0 %v2854_v52 }
 0x12e   :  { %2365 = vmatpush3.bf16.msra.mxu0 %v2854_v52 }
 0x12f   :  { %2367 = vmatprep.subr.bf16.mxu0 %v2676_v14 }
 0x131   :  { %1959 = vmatmul.mubr.f32.vlgmr.msra.gmra.mrb[0].mxu0 %v3004_v13 }
 0x132   :  { %2369 = vmatpush3.bf16.msra.mxu0 %v2676_v14  ;;  %1993 = vmatprep.mubr.f32.mxu0 %v2997_v8 }
 0x133   :  { %2371 = vmatprep.subr.bf16.mxu0 %v2686_v19 }
 0x136   :  { %2373 = vmatpush3.bf16.msra.mxu0 %v2686_v19 }
 0x137   :  { %2375 = vmatprep.subr.bf16.mxu0 %v2706_v23 }
 0x13a   :  { %2377 = vmatpush3.bf16.msra.mxu0 %v2706_v23 }
 0x13b   :  { %2379 = vmatprep.subr.bf16.mxu0 %v2726_v31 }
 0x13e   :  { %2381 = vmatpush3.bf16.msra.mxu0 %v2726_v31 }
 0x13f   :  { %2383 = vmatprep.subr.bf16.mxu0 %v2759_v45 }
 0x142   :  { %2385 = vmatpush3.bf16.msra.mxu0 %v2759_v45 }
 0x143   :  { %2387 = vmatprep.subr.bf16.mxu0 %v2776_v57 }
 0x146   :  { %2389 = vmatpush3.bf16.msra.mxu0 %v2776_v57 }
 0x147   :  { %2391 = vmatprep.subr.bf16.mxu0 %v2783_v59 }
 0x14a   :  { %2393 = vmatpush3.bf16.msra.mxu0 %v2783_v59 }
 0x14b   :  { %2395 = vmatprep.subr.bf16.mxu0 %v2785_v60 }
 0x14e   :  { %2397 = vmatpush3.bf16.msra.mxu0 %v2785_v60 }
 0x151   :  { %1994 = vmatmul.mubr.f32.vlgmr.msra.gmra.mrb[0].mxu0 %v3004_v13 }
 0x199   :  { %v2205_v14 = vpop.f32.mrb[0].mxu1 }
 0x19a   :  { %vm1535_vm1 = vcmp.gt.f32.partialorder %v2205_v14, 0.0  ;;  %v1524_v19 = vpop.f32.mrb[1].mxu1 }
 0x19b   :  { %v1569_v23 = vsel %vm1535_vm1, 1.0, %v2619_v29  ;;  %vm1534_vm2 = vcmp.gt.f32.partialorder %v1524_v19, 0.0 }
 0x19c   :  { %v1568_v31 = vsel %vm1534_vm2, 1.0, %v2619_v29 }
 0x19d   :  { %v1545_v45 = vadd.f32 %v1569_v23, %v1568_v31 }
 0x19f   :  { %1547 = vst [vmem:[%s3136_s4] sm:$0xff] %v1545_v45 }
 0x224   :  { %v1995_v57 = vpop.f32.mrb[0].mxu0 }
 0x225   :  { %v839_v59 = vmax.f32 %v1995_v57, 1.1754944e-38  ;;  %v828_v40 = vpop.f32.mrb[1].mxu0 }
 0x226   :  { %v838_v41 = vmax.f32 %v828_v40, 1.1754944e-38 }
 0x227   :  { %2615 = vlog2.f32 %v839_v59 }
 0x228   :  { %2617 = vlog2.f32 %v838_v41 }
 0x231   :  { %v2616_v60 = vpop.eup %2615 }
 0x232   :  { %v2618_v42 = vpop.eup %2617  ;;  %v843_v46 = vmul.f32 0.6931472, %v2616_v60 }
 0x233   :  { %v841_v47 = vmul.f32 0.6931472, %v2618_v42 }
 0x234   :  { %v845_v48 = vadd.f32 %v843_v46, %v2988_v4 }
 0x235   :  { %v844_v50 = vadd.f32 %v841_v47, %v2982_v28 }
 0x236   :  { %v849_v51 = vmul.f32 0.0, %v845_v48 }
 0x237   :  { %v846_v29 = vsub.f32 %v844_v50, %v2680_v17 }
 0x239   :  { %v848_v52 = vmul.f32 %v846_v29, %v2682_v18 }
 0x23b   :  { %v1541_v54 = vadd.f32 %v849_v51, %v848_v52 }
 0x23d   :  { %1543 = vst [vmem:[%s3137_s3] sm:$0xff] %v1541_v54 }

// kernel: train_ce_metrics.3
= control target key start
LH: loop header
LB: loop body
LE: loop exit
PB: predicated region body
PF: predicated region fallthrough
CT: control target
= control target key end

     0   :  { %v88_v0 = vlaneseq  ;;  %s3165_s0 = inlined_call_operand.vmem [shape: f32[10,128], index: 0, kind: input, shape index: {}]   ;;  %s3166_s2 = inlined_call_operand.vmem [shape: f32[128,128], index: 2, kind: input, shape index: {}]   ;;  %s3167_s1 = inlined_call_operand.vmem [shape: f32[10,128], index: 1, kind: input, shape index: {}]   ;;  %s3168_s4 = inlined_call_operand.vmem [shape: f32[8,128], index: 4, kind: output, shape index: {1}]   ;;  %s3169_s3 = inlined_call_operand.vmem [shape: f32[8,128], index: 3, kind: output, shape index: {0}]  }
   0x1   :  { %v2628_v1 = vld [vmem:[%s3165_s0] sm:$0xff]  ;;  %v109_v3 = vld [vmem:[%s3166_s2 + $0x8] sm:$0xff]  ;;  %v110_v8 = vld [vmem:[%s3166_s2 + $0x10] sm:$0xff] }
   0x2   :  { %v108_v2 = vld [vmem:[%s3166_s2] sm:$0xff]  ;;  %124 = vmax.xlane.f32.xlu0 %v2628_v1  ;;  %v138_v5 = vand.u32 4294901760, %v109_v3  ;;  %v89_v6 = vshrl.u32 %v88_v0, 7  ;;  %v111_v9 = vld [vmem:[%s3166_s2 + $0x18] sm:$0xff]  ;;  %v97_v13 = vld [vmem:[%s3165_s0 + $0x8] sm:$0xff]  ;;  %v141_v14 = vand.u32 4294901760, %v110_v8 }
   0x3   :  { %v135_v4 = vand.u32 4294901760, %v108_v2  ;;  %v2640_v7 = vld [vmem:[%s3167_s1] sm:$0xff]  ;;  %v144_v15 = vand.u32 4294901760, %v111_v9  ;;  %v2661_v16 = vld [vmem:[%s3166_s2 + $0x28] sm:$0xff]  ;;  %v2668_v19 = vld [vmem:[%s3166_s2 + $0x30] sm:$0xff] }
   0x4   :  { %v2651_v10 = vld [vmem:[%s3166_s2 + $0x20] sm:$0xff]  ;;  %v90_v12 = vadd.s32 8, %v89_v6  ;;  %v150_v18 = vand.u32 4294901760, %v2661_v16  ;;  %v2673_v20 = vld [vmem:[%s3166_s2 + $0x38] sm:$0xff]  ;;  %v2677_v21 = vand.u32 4294901760, %v2640_v7  ;;  %v153_v25 = vand.u32 4294901760, %v2668_v19 }
   0x5   :  { %v2653_v11 = vpack.c.bf16 %v138_v5, %v135_v4  ;;  %v147_v17 = vand.u32 4294901760, %v2651_v10  ;;  %v2679_v22 = vpack.c.bf16 %v144_v15, %v141_v14  ;;  %v156_v26 = vand.u32 4294901760, %v2673_v20  ;;  %v2700_v27 = vld [vmem:[%s3166_s2 + $0x40] sm:$0xff]  ;;  %v2705_v28 = vld [vmem:[%s3166_s2 + $0x48] sm:$0xff]  ;;  %v118_v36 = vld [vmem:[%s3166_s2 + $0x50] sm:$0xff] }
   0x6   :  { %vm95_vm0 = vcmp.lt.s32.totalorder %v90_v12, 10  ;;  %v105_v29 = vld [vmem:[%s3167_s1 + $0x8] sm:$0xff]  ;;  %v2713_v30 = vsub.f32 %v2640_v7, %v2677_v21  ;;  %v159_v31 = vand.u32 4294901760, %v2700_v27  ;;  %v162_v32 = vand.u32 4294901760, %v2705_v28  ;;  %v119_v37 = vld [vmem:[%s3166_s2 + $0x58] sm:$0xff]  ;;  %v120_v43 = vld [vmem:[%s3166_s2 + $0x60] sm:$0xff] }
   0x7   :  { %2379 = vmatprep.subr.bf16.mxu1 %v2653_v11  ;;  %2187 = vmatprep.subr.bf16.mxu0 %v2653_v11  ;;  %v2684_v23 = vsel %vm95_vm0, %v97_v13, 0.0  ;;  %v2693_v24 = vpack.c.bf16 %v150_v18, %v147_v17  ;;  %v2719_v33 = vsel %vm95_vm0, %v105_v29, 0.0  ;;  %v2726_v34 = vpack.c.bf16 %v156_v26, %v153_v25  ;;  %v121_v46 = vld [vmem:[%s3166_s2 + $0x68] sm:$0xff]  ;;  %v122_v47 = vld [vmem:[%s3166_s2 + $0x70] sm:$0xff]  ;;  %v123_v48 = vld [vmem:[%s3166_s2 + $0x78] sm:$0xff] }
   0x8   :  { %2381 = vmatpush3.bf16.msra.mxu1 %v2653_v11  ;;  %2189 = vmatpush3.bf16.msra.mxu0 %v2653_v11  ;;  %v913_v35 = vand.u32 4294901760, %v2713_v30  ;;  %v2736_v38 = vsub.f32 %v108_v2, %v135_v4  ;;  %v2738_v39 = vsub.f32 %v109_v3, %v138_v5  ;;  %v2745_v41 = vand.u32 4294901760, %v2719_v33 }
   0x9   :  { %126 = vmax.xlane.f32.xlu0 %v2684_v23  ;;  %2383 = vmatprep.subr.bf16.mxu1 %v2679_v22  ;;  %v2748_v42 = vpack.c.bf16 %v162_v32, %v159_v31  ;;  %v165_v44 = vand.u32 4294901760, %v118_v36  ;;  %v168_v45 = vand.u32 4294901760, %v119_v37  ;;  %v2763_v50 = vsub.f32 %v110_v8, %v141_v14 }
   0xa   :  { %2191 = vmatprep.subr.bf16.mxu0 %v2679_v22  ;;  %v914_v40 = vsub.f32 %v2713_v30, %v913_v35  ;;  %v238_v51 = vand.u32 4294901760, %v2736_v38  ;;  %v245_v52 = vand.u32 4294901760, %v2738_v39  ;;  %v2768_v53 = vsub.f32 %v111_v9, %v144_v15 }
   0xb   :  { %v171_v54 = vand.u32 4294901760, %v120_v43  ;;  %v174_v55 = vand.u32 4294901760, %v121_v46  ;;  %v177_v56 = vand.u32 4294901760, %v122_v47  ;;  %v180_v57 = vand.u32 4294901760, %v123_v48 }
   0xc   :  { %2385 = vmatpush3.bf16.msra.mxu1 %v2679_v22  ;;  %2193 = vmatpush3.bf16.msra.mxu0 %v2679_v22  ;;  %v915_v49 = vand.u32 4294901760, %v914_v40  ;;  %v2774_v58 = vsub.f32 %v2719_v33, %v2745_v41  ;;  %v2777_v59 = vpack.c.bf16 %v168_v45, %v165_v44  ;;  %v252_v60 = vand.u32 4294901760, %v2763_v50 }
   0xd   :  { %2387 = vmatprep.subr.bf16.mxu1 %v2693_v24  ;;  %2195 = vmatprep.subr.bf16.mxu0 %v2693_v24  ;;  %v2783_v61 = vsub.f32 %v2651_v10, %v147_v17  ;;  %v239_v62 = vsub.f32 %v2736_v38, %v238_v51  ;;  %v246_v63 = vsub.f32 %v2738_v39, %v245_v52  ;;  %v259_v0 = vand.u32 4294901760, %v2768_v53 }
   0xe   :  { %2008 = vmatprep.mubr.f32.mxu1 %v915_v49  ;;  %v2796_v2 = vsub.f32 %v2661_v16, %v150_v18  ;;  %v2800_v3 = vpack.c.bf16 %v174_v55, %v171_v54  ;;  %v2803_v4 = vpack.c.bf16 %v180_v57, %v177_v56  ;;  %v3170_v5 = vand.u32 4294901760, %v2774_v58 }
   0xf   :  { %v253_v6 = vsub.f32 %v2763_v50, %v252_v60  ;;  %v266_v8 = vand.u32 4294901760, %v2783_v61  ;;  %v240_v9 = vand.u32 4294901760, %v239_v62  ;;  %v247_v10 = vand.u32 4294901760, %v246_v63 }
  0x10   :  { %2389 = vmatpush3.bf16.msra.mxu1 %v2693_v24  ;;  %2197 = vmatpush3.bf16.msra.mxu0 %v2693_v24  ;;  %v260_v12 = vsub.f32 %v2768_v53, %v259_v0  ;;  %v273_v13 = vand.u32 4294901760, %v2796_v2  ;;  %v2815_v14 = vsub.f32 %v2668_v19, %v153_v25  ;;  %v2820_v15 = vsub.f32 %v2673_v20, %v156_v26 }
  0x11   :  { %2391 = vmatprep.subr.bf16.mxu1 %v2726_v34  ;;  %2199 = vmatprep.subr.bf16.mxu0 %v2726_v34  ;;  %v2823_v16 = vsub.f32 %v2700_v27, %v159_v31  ;;  %v2826_v17 = vsub.f32 %v2705_v28, %v162_v32  ;;  %v2829_v18 = vsub.f32 %v118_v36, %v165_v44  ;;  %v254_v25 = vand.u32 4294901760, %v253_v6 }
  0x12   :  { %v2831_v29 = vsub.f32 %v119_v37, %v168_v45  ;;  %v2833_v40 = vsub.f32 %v120_v43, %v171_v54  ;;  %v2835_v19 = vsub.f32 %v121_v46, %v174_v55  ;;  %v924_v20 = vsub.f32 %v2774_v58, %v3170_v5 }
  0x13   :  { %v2841_v26 = vsub.f32 %v122_v47, %v177_v56  ;;  %v2843_v27 = vsub.f32 %v123_v48, %v180_v57  ;;  %v2846_v28 = vpack.c.bf16 %v247_v10, %v240_v9  ;;  %v261_v31 = vand.u32 4294901760, %v260_v12 }
  0x14   :  { %2393 = vmatpush3.bf16.msra.mxu1 %v2726_v34  ;;  %2201 = vmatpush3.bf16.msra.mxu0 %v2726_v34  ;;  %v267_v32 = vsub.f32 %v2783_v61, %v266_v8  ;;  %v274_v36 = vsub.f32 %v2796_v2, %v273_v13  ;;  %v280_v37 = vand.u32 4294901760, %v2815_v14  ;;  %v287_v43 = vand.u32 4294901760, %v2820_v15 }
  0x15   :  { %2395 = vmatprep.subr.bf16.mxu1 %v2748_v42  ;;  %2203 = vmatprep.subr.bf16.mxu0 %v2748_v42  ;;  %v294_v44 = vand.u32 4294901760, %v2823_v16  ;;  %v301_v45 = vand.u32 4294901760, %v2826_v17  ;;  %v308_v46 = vand.u32 4294901760, %v2829_v18  ;;  %v315_v47 = vand.u32 4294901760, %v2831_v29 }
  0x16   :  { %v322_v48 = vand.u32 4294901760, %v2833_v40  ;;  %v329_v49 = vand.u32 4294901760, %v2835_v19  ;;  %v336_v54 = vand.u32 4294901760, %v2841_v26  ;;  %v343_v55 = vand.u32 4294901760, %v2843_v27 }
  0x17   :  { %v2867_v56 = vpack.c.bf16 %v245_v52, %v238_v51  ;;  %v2869_v57 = vpack.c.bf16 %v259_v0, %v252_v60  ;;  %v2872_v62 = vpack.c.bf16 %v273_v13, %v266_v8  ;;  %v2874_v63 = vpack.c.bf16 %v287_v43, %v280_v37 }
  0x18   :  { %2397 = vmatpush3.bf16.msra.mxu1 %v2748_v42  ;;  %2205 = vmatpush3.bf16.msra.mxu0 %v2748_v42  ;;  %v2876_v6 = vpack.c.bf16 %v301_v45, %v294_v44  ;;  %v2878_v9 = vpack.c.bf16 %v315_v47, %v308_v46  ;;  %v925_v10 = vand.u32 4294901760, %v924_v20  ;;  %v2881_v12 = vpack.c.bf16 %v329_v49, %v322_v48 }
  0x19   :  { %2399 = vmatprep.subr.bf16.mxu1 %v2777_v59  ;;  %2207 = vmatprep.subr.bf16.mxu0 %v2777_v59  ;;  %v2883_v5 = vpack.c.bf16 %v343_v55, %v336_v54  ;;  %v268_v51 = vand.u32 4294901760, %v267_v32  ;;  %v2887_v52 = vpack.c.bf16 %v261_v31, %v254_v25  ;;  %v275_v60 = vand.u32 4294901760, %v274_v36 }
  0x1a   :  { %v281_v0 = vsub.f32 %v2815_v14, %v280_v37  ;;  %v288_v8 = vsub.f32 %v2820_v15, %v287_v43  ;;  %v295_v13 = vsub.f32 %v2823_v16, %v294_v44  ;;  %v302_v32 = vsub.f32 %v2826_v17, %v301_v45 }
  0x1b   :  { %v2897_v20 = vpack.c.bf16 %v275_v60, %v268_v51  ;;  %v309_v44 = vsub.f32 %v2829_v18, %v308_v46  ;;  %v323_v51 = vsub.f32 %v2833_v40, %v322_v48  ;;  %v344_v48 = vsub.f32 %v2843_v27, %v343_v55 }
  0x1c   :  { %2401 = vmatpush3.bf16.msra.mxu1 %v2777_v59  ;;  %2209 = vmatpush3.bf16.msra.mxu0 %v2777_v59  ;;  %v282_v25 = vand.u32 4294901760, %v281_v0  ;;  %v289_v31 = vand.u32 4294901760, %v288_v8  ;;  %v296_v36 = vand.u32 4294901760, %v295_v13  ;;  %v303_v43 = vand.u32 4294901760, %v302_v32 }
  0x1d   :  { %2403 = vmatprep.subr.bf16.mxu1 %v2800_v3  ;;  %2211 = vmatprep.subr.bf16.mxu0 %v2800_v3  ;;  %v310_v45 = vand.u32 4294901760, %v309_v44  ;;  %v330_v8 = vsub.f32 %v2835_v19, %v329_v49  ;;  %v324_v13 = vand.u32 4294901760, %v323_v51  ;;  %v345_v49 = vand.u32 4294901760, %v344_v48 }
  0x1e   :  { %v2902_v37 = vpack.c.bf16 %v289_v31, %v282_v25  ;;  %v2909_v60 = vpack.c.bf16 %v303_v43, %v296_v36  ;;  %v337_v25 = vsub.f32 %v2841_v26, %v336_v54  ;;  %v2930_v54 = vpack.c.bf16 %v2738_v39, %v2736_v38 }
  0x1f   :  { %v2936_v55 = vpack.c.bf16 %v2768_v53, %v2763_v50  ;;  %v2944_v38 = vpack.c.bf16 %v2796_v2, %v2783_v61  ;;  %v2950_v39 = vpack.c.bf16 %v2820_v15, %v2815_v14  ;;  %v2956_v50 = vpack.c.bf16 %v2826_v17, %v2823_v16 }
  0x20   :  { %2405 = vmatpush3.bf16.msra.mxu1 %v2800_v3  ;;  %2213 = vmatpush3.bf16.msra.mxu0 %v2800_v3  ;;  %v338_v32 = vand.u32 4294901760, %v337_v25  ;;  %v2962_v53 = vpack.c.bf16 %v2831_v29, %v2829_v18  ;;  %v2968_v61 = vpack.c.bf16 %v2835_v19, %v2833_v40  ;;  %v2974_v2 = vpack.c.bf16 %v2843_v27, %v2841_v26 }
  0x21   :  { %2407 = vmatprep.subr.bf16.mxu1 %v2803_v4  ;;  %2215 = vmatprep.subr.bf16.mxu0 %v2803_v4 }
  0x22   :  { %v2924_v36 = vpack.c.bf16 %v345_v49, %v338_v32 }
  0x24   :  { %2409 = vmatpush3.bf16.msra.mxu1 %v2803_v4  ;;  %2217 = vmatpush3.bf16.msra.mxu0 %v2803_v4 }
  0x25   :  { %2411 = vmatprep.subr.bf16.mxu1 %v2846_v28  ;;  %2219 = vmatprep.subr.bf16.mxu0 %v2846_v28 }
  0x27   :  { %2009 = vmatmul.mubr.f32.vlgmr.msra.gmra.mrb[0].mxu1 %v925_v10  ;;  %v316_v10 = vsub.f32 %v2831_v29, %v315_v47  ;;  %v331_v47 = vand.u32 4294901760, %v330_v8 }
  0x28   :  { %2413 = vmatpush3.bf16.msra.mxu1 %v2846_v28  ;;  %2043 = vmatprep.mubr.f32.mxu1 %v2677_v21 }
  0x29   :  { %2415 = vmatprep.subr.bf16.mxu1 %v2887_v52  ;;  %v317_v0 = vand.u32 4294901760, %v316_v10  ;;  %v2920_v31 = vpack.c.bf16 %v331_v47, %v324_v13 }
  0x2b   :  { %v2914_v46 = vpack.c.bf16 %v317_v0, %v310_v45 }
  0x2c   :  { %2417 = vmatpush3.bf16.msra.mxu1 %v2887_v52 }
  0x2d   :  { %2419 = vmatprep.subr.bf16.mxu1 %v2897_v20 }
  0x30   :  { %2421 = vmatpush3.bf16.msra.mxu1 %v2897_v20 }
  0x31   :  { %2423 = vmatprep.subr.bf16.mxu1 %v2902_v37 }
  0x34   :  { %2425 = vmatpush3.bf16.msra.mxu1 %v2902_v37 }
  0x35   :  { %2427 = vmatprep.subr.bf16.mxu1 %v2909_v60 }
  0x38   :  { %2429 = vmatpush3.bf16.msra.mxu1 %v2909_v60 }
  0x39   :  { %2431 = vmatprep.subr.bf16.mxu1 %v2914_v46 }
  0x3c   :  { %2433 = vmatpush3.bf16.msra.mxu1 %v2914_v46 }
  0x3d   :  { %2435 = vmatprep.subr.bf16.mxu1 %v2920_v31 }
  0x40   :  { %2437 = vmatpush3.bf16.msra.mxu1 %v2920_v31 }
  0x41   :  { %2439 = vmatprep.subr.bf16.mxu1 %v2924_v36 }
  0x44   :  { %2441 = vmatpush3.bf16.msra.mxu1 %v2924_v36 }
  0x45   :  { %2443 = vmatprep.subr.bf16.mxu1 %v2930_v54 }
  0x47   :  { %2044 = vmatmul.mubr.f32.vlgmr.msra.gmra.mrb[0].mxu1 %v2745_v41 }
  0x48   :  { %2445 = vmatpush3.bf16.msra.mxu1 %v2930_v54  ;;  %2078 = vmatprep.mubr.f32.mxu1 %v2713_v30  ;;  %v3171_v30 = vand.u32 4294901760, %v2774_v58 }
  0x49   :  { %2447 = vmatprep.subr.bf16.mxu1 %v2936_v55 }
  0x4c   :  { %2449 = vmatpush3.bf16.msra.mxu1 %v2936_v55 }
  0x4d   :  { %2451 = vmatprep.subr.bf16.mxu1 %v2944_v38 }
  0x50   :  { %2453 = vmatpush3.bf16.msra.mxu1 %v2944_v38 }
  0x51   :  { %2455 = vmatprep.subr.bf16.mxu1 %v2950_v39 }
  0x54   :  { %2457 = vmatpush3.bf16.msra.mxu1 %v2950_v39 }
  0x55   :  { %2459 = vmatprep.subr.bf16.mxu1 %v2956_v50 }
  0x58   :  { %2461 = vmatpush3.bf16.msra.mxu1 %v2956_v50 }
  0x59   :  { %2463 = vmatprep.subr.bf16.mxu1 %v2962_v53 }
  0x5c   :  { %2465 = vmatpush3.bf16.msra.mxu1 %v2962_v53 }
  0x5d   :  { %2467 = vmatprep.subr.bf16.mxu1 %v2968_v61 }
  0x60   :  { %2469 = vmatpush3.bf16.msra.mxu1 %v2968_v61 }
  0x61   :  { %2471 = vmatprep.subr.bf16.mxu1 %v2974_v2 }
  0x64   :  { %2473 = vmatpush3.bf16.msra.mxu1 %v2974_v2 }
  0x65   :  { %2475 = vmatprep.subr.bf16.mxu1 %v2653_v11 }
  0x67   :  { %2079 = vmatmul.mubr.f32.vlgmr.msra.gmra.mrb[0].mxu1 %v2774_v58 }
  0x68   :  { %2477 = vmatpush3.bf16.msra.mxu1 %v2653_v11  ;;  %2113 = vmatprep.mubr.f32.mxu1 %v913_v35 }
  0x69   :  { %2479 = vmatprep.subr.bf16.mxu1 %v2679_v22 }
  0x6c   :  { %2481 = vmatpush3.bf16.msra.mxu1 %v2679_v22 }
  0x6d   :  { %2483 = vmatprep.subr.bf16.mxu1 %v2693_v24 }
  0x70   :  { %2485 = vmatpush3.bf16.msra.mxu1 %v2693_v24 }
  0x71   :  { %2487 = vmatprep.subr.bf16.mxu1 %v2726_v34 }
  0x74   :  { %2489 = vmatpush3.bf16.msra.mxu1 %v2726_v34 }
  0x75   :  { %2491 = vmatprep.subr.bf16.mxu1 %v2748_v42 }
  0x78   :  { %2493 = vmatpush3.bf16.msra.mxu1 %v2748_v42 }
  0x79   :  { %2495 = vmatprep.subr.bf16.mxu1 %v2777_v59 }
  0x7c   :  { %2497 = vmatpush3.bf16.msra.mxu1 %v2777_v59 }
  0x7d   :  { %2499 = vmatprep.subr.bf16.mxu1 %v2800_v3 }
  0x80   :  { %2501 = vmatpush3.bf16.msra.mxu1 %v2800_v3 }
  0x81   :  { %2503 = vmatprep.subr.bf16.mxu1 %v2803_v4 }
  0x84   :  { %2505 = vmatpush3.bf16.msra.mxu1 %v2803_v4 }
  0x85   :  { %2507 = vmatprep.subr.bf16.mxu1 %v2867_v56 }
  0x87   :  { %2114 = vmatmul.mubr.f32.vlgmr.msra.gmra.mrb[0].mxu1 %v3171_v30 }
  0x88   :  { %2509 = vmatpush3.bf16.msra.mxu1 %v2867_v56  ;;  %2148 = vmatprep.mubr.f32.mxu1 %v2677_v21 }
  0x89   :  { %2511 = vmatprep.subr.bf16.mxu1 %v2869_v57 }
  0x8c   :  { %2513 = vmatpush3.bf16.msra.mxu1 %v2869_v57 }
  0x8d   :  { %2515 = vmatprep.subr.bf16.mxu1 %v2872_v62 }
  0x8f   :  { %v3007_v35 = vpop.xlane.xlu0 %124 }
  0x90   :  { %2517 = vmatpush3.bf16.msra.mxu1 %v2872_v62  ;;  %v128_v14 = vsub.f32 %v2628_v1, %v3007_v35 }
  0x91   :  { %2519 = vmatprep.subr.bf16.mxu1 %v2874_v63 }
  0x92   :  { %v130_v58 = vmul.f32 1.442695, %v128_v14 }
  0x94   :  { %2521 = vmatpush3.bf16.msra.mxu1 %v2874_v63  ;;  %2591 = vpow2.f32 %v130_v58 }
  0x95   :  { %2523 = vmatprep.subr.bf16.mxu1 %v2876_v6 }
  0x96   :  { %v3014_v15 = vpop.xlane.xlu0 %126 }
  0x97   :  { %v129_v16 = vsub.f32 %v2684_v23, %v3014_v15 }
  0x98   :  { %2525 = vmatpush3.bf16.msra.mxu1 %v2876_v6 }
  0x99   :  { %v132_v17 = vmul.f32 1.442695, %v129_v16  ;;  %2527 = vmatprep.subr.bf16.mxu1 %v2878_v9 }
  0x9b   :  { %2593 = vpow2.f32 %v132_v17 }
  0x9c   :  { %2529 = vmatpush3.bf16.msra.mxu1 %v2878_v9 }
  0x9d   :  { %2531 = vmatprep.subr.bf16.mxu1 %v2881_v12 }
  0x9e   :  { %v2592_v18 = vpop.eup %2591 }
  0x9f   :  { %v3023_v29 = vand.u32 4294901760, %v2592_v18 }
  0xa0   :  { %2533 = vmatpush3.bf16.msra.mxu1 %v2881_v12 }
  0xa1   :  { %2535 = vmatprep.subr.bf16.mxu1 %v2883_v5  ;;  %v3027_v40 = vsub.f32 %v2592_v18, %v3023_v29 }
  0xa3   :  { %v217_v19 = vand.u32 4294901760, %v3027_v40 }
  0xa4   :  { %2537 = vmatpush3.bf16.msra.mxu1 %v2883_v5 }
  0xa5   :  { %v2594_v26 = vpop.eup %2593  ;;  %2539 = vmatprep.subr.bf16.mxu1 %v2653_v11  ;;  %v218_v43 = vsub.f32 %v3027_v40, %v217_v19 }
  0xa6   :  { %v3032_v27 = vand.u32 4294901760, %v2594_v26 }
  0xa7   :  { %2149 = vmatmul.mubr.f32.vlgmr.msra.gmra.mrb[0].mxu1 %v2745_v41  ;;  %v219_v44 = vand.u32 4294901760, %v218_v43 }
  0xa8   :  { %2541 = vmatpush3.bf16.msra.mxu1 %v2653_v11  ;;  %v3040_v10 = vsub.f32 %v2594_v26, %v3032_v27  ;;  %2183 = vmatprep.mubr.f32.mxu1 %v2677_v21 }
  0xa9   :  { %2543 = vmatprep.subr.bf16.mxu1 %v2679_v22  ;;  %1798 = vmatprep.mubr.f32.mxu0 %v219_v44 }
  0xaa   :  { %v227_v51 = vand.u32 4294901760, %v3040_v10 }
  0xac   :  { %2545 = vmatpush3.bf16.msra.mxu1 %v2679_v22  ;;  %v228_v45 = vsub.f32 %v3040_v10, %v227_v51 }
  0xad   :  { %2547 = vmatprep.subr.bf16.mxu1 %v2693_v24 }
  0xae   :  { %v229_v0 = vand.u32 4294901760, %v228_v45 }
  0xb0   :  { %1799 = vmatmul.mubr.f32.vlgmr.msra.gmra.mrb[0].mxu0 %v229_v0  ;;  %2549 = vmatpush3.bf16.msra.mxu1 %v2693_v24 }
  0xb1   :  { %2221 = vmatpush3.bf16.msra.mxu0 %v2846_v28  ;;  %1833 = vmatprep.mubr.f32.mxu0 %v3023_v29 }
  0xb2   :  { %2223 = vmatprep.subr.bf16.mxu0 %v2887_v52  ;;  %2551 = vmatprep.subr.bf16.mxu1 %v2726_v34 }
  0xb4   :  { %2553 = vmatpush3.bf16.msra.mxu1 %v2726_v34 }
  0xb5   :  { %2225 = vmatpush3.bf16.msra.mxu0 %v2887_v52  ;;  %2555 = vmatprep.subr.bf16.mxu1 %v2748_v42 }
  0xb6   :  { %2227 = vmatprep.subr.bf16.mxu0 %v2897_v20 }
  0xb8   :  { %2557 = vmatpush3.bf16.msra.mxu1 %v2748_v42 }
  0xb9   :  { %2229 = vmatpush3.bf16.msra.mxu0 %v2897_v20  ;;  %2559 = vmatprep.subr.bf16.mxu1 %v2777_v59 }
  0xba   :  { %2231 = vmatprep.subr.bf16.mxu0 %v2902_v37 }
  0xbc   :  { %2561 = vmatpush3.bf16.msra.mxu1 %v2777_v59 }
  0xbd   :  { %2233 = vmatpush3.bf16.msra.mxu0 %v2902_v37  ;;  %2563 = vmatprep.subr.bf16.mxu1 %v2800_v3 }
  0xbe   :  { %2235 = vmatprep.subr.bf16.mxu0 %v2909_v60 }
  0xc0   :  { %2565 = vmatpush3.bf16.msra.mxu1 %v2800_v3 }
  0xc1   :  { %2237 = vmatpush3.bf16.msra.mxu0 %v2909_v60  ;;  %2567 = vmatprep.subr.bf16.mxu1 %v2803_v4 }
  0xc2   :  { %2239 = vmatprep.subr.bf16.mxu0 %v2914_v46 }
  0xc4   :  { %2569 = vmatpush3.bf16.msra.mxu1 %v2803_v4 }
  0xc5   :  { %2241 = vmatpush3.bf16.msra.mxu0 %v2914_v46 }
  0xc6   :  { %2243 = vmatprep.subr.bf16.mxu0 %v2920_v31 }
  0xc7   :  { %2184 = vmatmul.mubr.f32.vlgmr.msra.gmra.mrb[0].mxu1 %v2745_v41 }
  0xc9   :  { %2245 = vmatpush3.bf16.msra.mxu0 %v2920_v31 }
  0xca   :  { %2247 = vmatprep.subr.bf16.mxu0 %v2924_v36 }
  0xcd   :  { %2249 = vmatpush3.bf16.msra.mxu0 %v2924_v36 }
  0xce   :  { %2251 = vmatprep.subr.bf16.mxu0 %v2930_v54 }
  0xd0   :  { %1834 = vmatmul.mubr.f32.vlgmr.msra.gmra.mrb[0].mxu0 %v3032_v27 }
  0xd1   :  { %2253 = vmatpush3.bf16.msra.mxu0 %v2930_v54  ;;  %1868 = vmatprep.mubr.f32.mxu0 %v3027_v40 }
  0xd2   :  { %2255 = vmatprep.subr.bf16.mxu0 %v2936_v55 }
  0xd5   :  { %2257 = vmatpush3.bf16.msra.mxu0 %v2936_v55 }
  0xd6   :  { %2259 = vmatprep.subr.bf16.mxu0 %v2944_v38 }
  0xd9   :  { %2261 = vmatpush3.bf16.msra.mxu0 %v2944_v38 }
  0xda   :  { %2263 = vmatprep.subr.bf16.mxu0 %v2950_v39 }
  0xdd   :  { %2265 = vmatpush3.bf16.msra.mxu0 %v2950_v39 }
  0xde   :  { %2267 = vmatprep.subr.bf16.mxu0 %v2956_v50 }
  0xe1   :  { %2269 = vmatpush3.bf16.msra.mxu0 %v2956_v50 }
  0xe2   :  { %2271 = vmatprep.subr.bf16.mxu0 %v2962_v53 }
  0xe5   :  { %2273 = vmatpush3.bf16.msra.mxu0 %v2962_v53 }
  0xe6   :  { %2275 = vmatprep.subr.bf16.mxu0 %v2968_v61 }
  0xe9   :  { %2277 = vmatpush3.bf16.msra.mxu0 %v2968_v61 }
  0xea   :  { %2279 = vmatprep.subr.bf16.mxu0 %v2974_v2 }
  0xed   :  { %2281 = vmatpush3.bf16.msra.mxu0 %v2974_v2 }
  0xee   :  { %2283 = vmatprep.subr.bf16.mxu0 %v2653_v11 }
  0xf0   :  { %1869 = vmatmul.mubr.f32.vlgmr.msra.gmra.mrb[0].mxu0 %v3040_v10 }
  0xf1   :  { %2285 = vmatpush3.bf16.msra.mxu0 %v2653_v11  ;;  %1903 = vmatprep.mubr.f32.mxu0 %v217_v19 }
  0xf2   :  { %2287 = vmatprep.subr.bf16.mxu0 %v2679_v22 }
  0xf5   :  { %2289 = vmatpush3.bf16.msra.mxu0 %v2679_v22 }
  0xf6   :  { %2291 = vmatprep.subr.bf16.mxu0 %v2693_v24 }
  0xf9   :  { %2293 = vmatpush3.bf16.msra.mxu0 %v2693_v24 }
  0xfa   :  { %2295 = vmatprep.subr.bf16.mxu0 %v2726_v34 }
  0xfd   :  { %2297 = vmatpush3.bf16.msra.mxu0 %v2726_v34 }
  0xfe   :  { %2299 = vmatprep.subr.bf16.mxu0 %v2748_v42 }
 0x101   :  { %2301 = vmatpush3.bf16.msra.mxu0 %v2748_v42 }
 0x102   :  { %2303 = vmatprep.subr.bf16.mxu0 %v2777_v59 }
 0x105   :  { %2305 = vmatpush3.bf16.msra.mxu0 %v2777_v59 }
 0x106   :  { %2307 = vmatprep.subr.bf16.mxu0 %v2800_v3 }
 0x109   :  { %2309 = vmatpush3.bf16.msra.mxu0 %v2800_v3 }
 0x10a   :  { %2311 = vmatprep.subr.bf16.mxu0 %v2803_v4 }
 0x10d   :  { %2313 = vmatpush3.bf16.msra.mxu0 %v2803_v4 }
 0x10e   :  { %2315 = vmatprep.subr.bf16.mxu0 %v2867_v56 }
 0x110   :  { %1904 = vmatmul.mubr.f32.vlgmr.msra.gmra.mrb[0].mxu0 %v227_v51 }
 0x111   :  { %2317 = vmatpush3.bf16.msra.mxu0 %v2867_v56  ;;  %1938 = vmatprep.mubr.f32.mxu0 %v3023_v29 }
 0x112   :  { %2319 = vmatprep.subr.bf16.mxu0 %v2869_v57 }
 0x115   :  { %2321 = vmatpush3.bf16.msra.mxu0 %v2869_v57 }
 0x116   :  { %2323 = vmatprep.subr.bf16.mxu0 %v2872_v62 }
 0x119   :  { %2325 = vmatpush3.bf16.msra.mxu0 %v2872_v62 }
 0x11a   :  { %2327 = vmatprep.subr.bf16.mxu0 %v2874_v63 }
 0x11d   :  { %2329 = vmatpush3.bf16.msra.mxu0 %v2874_v63 }
 0x11e   :  { %2331 = vmatprep.subr.bf16.mxu0 %v2876_v6 }
 0x121   :  { %2333 = vmatpush3.bf16.msra.mxu0 %v2876_v6 }
 0x122   :  { %2335 = vmatprep.subr.bf16.mxu0 %v2878_v9 }
 0x125   :  { %2337 = vmatpush3.bf16.msra.mxu0 %v2878_v9 }
 0x126   :  { %2339 = vmatprep.subr.bf16.mxu0 %v2881_v12 }
 0x129   :  { %2341 = vmatpush3.bf16.msra.mxu0 %v2881_v12 }
 0x12a   :  { %2343 = vmatprep.subr.bf16.mxu0 %v2883_v5 }
 0x12d   :  { %2345 = vmatpush3.bf16.msra.mxu0 %v2883_v5 }
 0x12e   :  { %2347 = vmatprep.subr.bf16.mxu0 %v2653_v11 }
 0x130   :  { %1939 = vmatmul.mubr.f32.vlgmr.msra.gmra.mrb[0].mxu0 %v3032_v27 }
 0x131   :  { %2349 = vmatpush3.bf16.msra.mxu0 %v2653_v11  ;;  %1973 = vmatprep.mubr.f32.mxu0 %v3023_v29 }
 0x132   :  { %2351 = vmatprep.subr.bf16.mxu0 %v2679_v22 }
 0x135   :  { %2353 = vmatpush3.bf16.msra.mxu0 %v2679_v22  ;;  %v2599_v22 = vmov 0.0  }
 0x136   :  { %2355 = vmatprep.subr.bf16.mxu0 %v2693_v24 }
 0x139   :  { %2357 = vmatpush3.bf16.msra.mxu0 %v2693_v24 }
 0x13a   :  { %2359 = vmatprep.subr.bf16.mxu0 %v2726_v34 }
 0x13d   :  { %2361 = vmatpush3.bf16.msra.mxu0 %v2726_v34 }
 0x13e   :  { %2363 = vmatprep.subr.bf16.mxu0 %v2748_v42 }
 0x141   :  { %2365 = vmatpush3.bf16.msra.mxu0 %v2748_v42 }
 0x142   :  { %2367 = vmatprep.subr.bf16.mxu0 %v2777_v59 }
 0x145   :  { %2369 = vmatpush3.bf16.msra.mxu0 %v2777_v59 }
 0x146   :  { %2371 = vmatprep.subr.bf16.mxu0 %v2800_v3 }
 0x149   :  { %2373 = vmatpush3.bf16.msra.mxu0 %v2800_v3 }
 0x14a   :  { %2375 = vmatprep.subr.bf16.mxu0 %v2803_v4 }
 0x14d   :  { %2377 = vmatpush3.bf16.msra.mxu0 %v2803_v4 }
 0x150   :  { %1974 = vmatmul.mubr.f32.vlgmr.msra.gmra.mrb[0].mxu0 %v3032_v27 }
 0x19a   :  { %v2185_v11 = vpop.f32.mrb[0].mxu1 }
 0x19b   :  { %vm1515_vm1 = vcmp.gt.f32.partialorder %v2185_v11, 0.0  ;;  %v1504_v21 = vpop.f32.mrb[1].mxu1 }
 0x19c   :  { %v1549_v24 = vsel %vm1515_vm1, 1.0, %v2599_v22  ;;  %vm1514_vm2 = vcmp.gt.f32.partialorder %v1504_v21, 0.0 }
 0x19d   :  { %v1548_v34 = vsel %vm1514_vm2, 1.0, %v2599_v22 }
 0x19e   :  { %v1525_v41 = vadd.f32 %v1549_v24, %v1548_v34 }
 0x1a0   :  { %1527 = vst [vmem:[%s3168_s4] sm:$0xff] %v1525_v41 }
 0x223   :  { %v1975_v42 = vpop.f32.mrb[0].mxu0 }
 0x224   :  { %v819_v59 = vmax.f32 %v1975_v42, 1.1754944e-38  ;;  %v808_v3 = vpop.f32.mrb[1].mxu0 }
 0x225   :  { %v818_v5 = vmax.f32 %v808_v3, 1.1754944e-38 }
 0x226   :  { %2595 = vlog2.f32 %v819_v59 }
 0x227   :  { %2597 = vlog2.f32 %v818_v5 }
 0x230   :  { %v2596_v4 = vpop.eup %2595 }
 0x231   :  { %v2598_v28 = vpop.eup %2597  ;;  %v823_v56 = vmul.f32 0.6931472, %v2596_v4 }
 0x232   :  { %v821_v57 = vmul.f32 0.6931472, %v2598_v28 }
 0x233   :  { %v825_v62 = vadd.f32 %v823_v56, %v3014_v15 }
 0x234   :  { %v824_v63 = vadd.f32 %v821_v57, %v3007_v35 }
 0x235   :  { %v827_v6 = vsub.f32 %v825_v62, %v2684_v23 }
 0x236   :  { %v826_v9 = vsub.f32 %v824_v63, %v2628_v1 }
 0x237   :  { %v829_v12 = vmul.f32 %v827_v6, %v2719_v33 }
 0x238   :  { %v828_v52 = vmul.f32 %v826_v9, %v2640_v7 }
 0x23a   :  { %v1521_v20 = vadd.f32 %v829_v12, %v828_v52 }
 0x23c   :  { %1523 = vst [vmem:[%s3169_s3] sm:$0xff] %v1521_v20 }

</bundles_post_ra>
